<compile_context>
chip_gen: v6e
topology: v6e:2x2x1
jax: 0.10.0
libtpu: 0.0.40
codegen_flags: <defaults>
</compile_context>

<pallas_src>
import jax
import jax.numpy as jnp
from jax.experimental import pallas as pl
from jax.experimental.pallas import tpu as pltpu

# Small, deterministic hyper-parameters consistent with the module.
NUM_USERS = 10
NUM_RECIPES = 12
NUM_INGREDIENTS = 20      # __init__ arg, unused in forward
H = 32                    # number_hstate
BATCH = 2
D1, D2, D3 = 100, 50, 1   # lin1/lin2/lin3 (and lin31/lin32/lin33) widths

jax.config.update("jax_default_matmul_precision", "highest")


def neural_cf2_kernel(x_ref, wa_ref, ba_ref, wb_ref, bb_ref, wc_ref, bc_ref,
                      out_ref):
    """Fused two-tower MLP.

    x_ref : (B, 2H)  -- [recipe_emb | user_emb] on the lane axis
    wa    : (2H, 2*D1) block-diag(lin1_w^T, lin31_w^T),  ba: (1, 2*D1)
    wb    : (2*D1, 2*D2) block-diag(lin2_w^T, lin32_w^T), bb: (1, 2*D2)
    wc    : (2*D2, 2)  block-diag(lin3_w^T, lin33_w^T),   bc: (1, 2)
    out   : (B, 1)  = r1 * r2
    """
    x = x_ref[...]                                                    # (B, 2H)
    h = jnp.dot(x, wa_ref[...], preferred_element_type=jnp.float32) + ba_ref[...]
    h = jnp.maximum(h, 0.0)                                           # (B, 200)
    # dropout_1 / dropout_2: identity in eval mode.
    h = jnp.dot(h, wb_ref[...], preferred_element_type=jnp.float32) + bb_ref[...]
    h = jnp.maximum(h, 0.0)                                           # (B, 100)
    y = jnp.dot(h, wc_ref[...], preferred_element_type=jnp.float32) + bc_ref[...]
    # y[:, 0] = r1 (recipe tower), y[:, 1] = r2 (user tower)
    out_ref[...] = y[:, 0:1] * y[:, 1:2]                              # (B, 1)


def init_params(key):
    ks = jax.random.split(key, 16)
    it = iter(ks)

    def nrm(shape, scale):
        return scale * jax.random.normal(next(it), shape, jnp.float32)

    params = {}
    # nn.Embedding with padding_idx=0 -> row 0 is zero.
    params['user_table'] = nrm((NUM_USERS + 1, H), 1.0).at[0].set(0.0)
    params['recipe_table'] = nrm((NUM_RECIPES + 1, H), 1.0).at[0].set(0.0)

    # torch nn.Linear layout: weight (out, in), bias (out,)
    params['lin1_w'] = nrm((D1, H), 1.0 / jnp.sqrt(H))
    params['lin1_b'] = nrm((D1,), 0.02)
    params['lin2_w'] = nrm((D2, D1), 0.1)
    params['lin2_b'] = nrm((D2,), 0.02)
    params['lin3_w'] = nrm((D3, D2), 1.0 / jnp.sqrt(D2))
    params['lin3_b'] = nrm((D3,), 0.02)

    params['lin31_w'] = nrm((D1, H), 1.0 / jnp.sqrt(H))
    params['lin31_b'] = nrm((D1,), 0.02)
    params['lin32_w'] = nrm((D2, D1), 0.1)
    params['lin32_b'] = nrm((D2,), 0.02)
    params['lin33_w'] = nrm((D3, D2), 1.0 / jnp.sqrt(D2))
    params['lin33_b'] = nrm((D3,), 0.02)
    return params


def _block_diag(a, b):
    m, n = a.shape
    p, q = b.shape
    out = jnp.zeros((m + p, n + q), jnp.float32)
    out = out.at[:m, :n].set(a)
    out = out.at[m:, n:].set(b)
    return out


def neural_cf2_forward(params, recipe, user):
    # Embedding gathers (tiny tables) are wrapper glue; everything else runs
    # in the Pallas kernel.
    rec_emb = params['recipe_table'][recipe]                    # (B, H)
    usr_emb = params['user_table'][user]                        # (B, H)
    x = jnp.concatenate([rec_emb, usr_emb], axis=-1).astype(jnp.float32)  # (B, 2H)
    B = x.shape[0]

    # Fuse the two towers into block-diagonal weights (done once, free).
    wa = _block_diag(params['lin1_w'].T, params['lin31_w'].T)   # (2H, 200)
    ba = jnp.concatenate([params['lin1_b'], params['lin31_b']]).reshape(1, -1)
    wb = _block_diag(params['lin2_w'].T, params['lin32_w'].T)   # (200, 100)
    bb = jnp.concatenate([params['lin2_b'], params['lin32_b']]).reshape(1, -1)
    wc = _block_diag(params['lin3_w'].T, params['lin33_w'].T)   # (100, 2)
    bc = jnp.concatenate([params['lin3_b'], params['lin33_b']]).reshape(1, -1)

    args = [x, wa, ba, wb, bb, wc, bc]
    out = pl.pallas_call(
        neural_cf2_kernel,
        out_shape=jax.ShapeDtypeStruct((B, 1), jnp.float32),
        in_specs=[pl.BlockSpec(memory_space=pltpu.MemorySpace.VMEM)] * len(args),
        out_specs=pl.BlockSpec(memory_space=pltpu.MemorySpace.VMEM),
    )(*args)
    return jnp.squeeze(out)          # matches torch.squeeze -> (B,)


# ---- pure-JAX reference (numerical sanity check, unfused) -------------------
def ref_forward(params, recipe, user):
    rec_emb = params['recipe_table'][recipe]
    r1 = jax.nn.relu(rec_emb @ params['lin1_w'].T + params['lin1_b'])
    r1 = jax.nn.relu(r1 @ params['lin2_w'].T + params['lin2_b'])
    r1 = r1 @ params['lin3_w'].T + params['lin3_b']

    usr_emb = params['user_table'][user]
    r2 = jax.nn.relu(usr_emb @ params['lin31_w'].T + params['lin31_b'])
    r2 = jax.nn.relu(r2 @ params['lin32_w'].T + params['lin32_b'])
    r2 = r2 @ params['lin33_w'].T + params['lin33_b']
    return jnp.squeeze(r2 * r1)


if __name__ == "__main__":
    key = jax.random.PRNGKey(0)
    kp, kr, ku = jax.random.split(key, 3)
    params = init_params(kp)
    recipe = jax.random.randint(kr, (BATCH,), 1, NUM_RECIPES + 1)
    user = jax.random.randint(ku, (BATCH,), 1, NUM_USERS + 1)

    out = jax.jit(neural_cf2_forward)(params, recipe, user)
    out = jax.block_until_ready(out)

    ref = ref_forward(params, recipe, user)
    assert out.shape == ref.shape == (BATCH,), (out.shape, ref.shape)
    if not jnp.allclose(out, ref, atol=1e-4, rtol=1e-3):
        raise AssertionError(f"kernel/ref mismatch: {out} vs {ref}")
    print("KERNEL_OK")
</pallas_src>

<mosaic_0001>
module attributes {stable_mosaic.version = 11 : i64} {
  func.func @neural_cf2_kernel(%arg0: memref<2x64xf32, #tpu.memory_space<vmem>>, %arg1: memref<64x200xf32, #tpu.memory_space<vmem>>, %arg2: memref<1x200xf32, #tpu.memory_space<vmem>>, %arg3: memref<200x100xf32, #tpu.memory_space<vmem>>, %arg4: memref<1x100xf32, #tpu.memory_space<vmem>>, %arg5: memref<100x2xf32, #tpu.memory_space<vmem>>, %arg6: memref<1x2xf32, #tpu.memory_space<vmem>>, %arg7: memref<2x1xf32, #tpu.memory_space<vmem>>) attributes {dimension_semantics = [], scalar_prefetch = 0 : i64, scratch_operands = 0 : i64, tpu.core_type = #tpu.core_type<tc>} {
    %c0 = arith.constant 0 : index
    %c0_0 = arith.constant 0 : index
    %0 = vector.load %arg0[%c0, %c0_0] : memref<2x64xf32, #tpu.memory_space<vmem>>, vector<2x64xf32>
    %c0_1 = arith.constant 0 : index
    %c0_2 = arith.constant 0 : index
    %1 = vector.load %arg1[%c0_1, %c0_2] : memref<64x200xf32, #tpu.memory_space<vmem>>, vector<64x200xf32>
    %cst = arith.constant dense<0.000000e+00> : vector<2x200xf32>
    %2 = tpu.matmul %0, %1, %cst {dimension_numbers = #tpu.dot_dimension_numbers<[1], [0], [0], [1], [0, 0, 1, 1], [], []>, precision = #tpu.contract_precision<fp32>} : vector<2x64xf32>, vector<64x200xf32>, vector<2x200xf32> -> vector<2x200xf32>
    %c0_3 = arith.constant 0 : index
    %c0_4 = arith.constant 0 : index
    %3 = vector.load %arg2[%c0_3, %c0_4] : memref<1x200xf32, #tpu.memory_space<vmem>>, vector<1x200xf32>
    %4 = vector.broadcast %3 : vector<1x200xf32> to vector<2x200xf32>
    %5 = arith.addf %2, %4 : vector<2x200xf32>
    %cst_5 = arith.constant 0.000000e+00 : f32
    %6 = vector.broadcast %cst_5 : f32 to vector<2x200xf32>
    %7 = arith.maximumf %5, %6 : vector<2x200xf32>
    %c0_6 = arith.constant 0 : index
    %c0_7 = arith.constant 0 : index
    %8 = vector.load %arg3[%c0_6, %c0_7] : memref<200x100xf32, #tpu.memory_space<vmem>>, vector<200x100xf32>
    %cst_8 = arith.constant dense<0.000000e+00> : vector<2x100xf32>
    %9 = tpu.matmul %7, %8, %cst_8 {dimension_numbers = #tpu.dot_dimension_numbers<[1], [0], [0], [1], [0, 0, 1, 1], [], []>, precision = #tpu.contract_precision<fp32>} : vector<2x200xf32>, vector<200x100xf32>, vector<2x100xf32> -> vector<2x100xf32>
    %c0_9 = arith.constant 0 : index
    %c0_10 = arith.constant 0 : index
    %10 = vector.load %arg4[%c0_9, %c0_10] : memref<1x100xf32, #tpu.memory_space<vmem>>, vector<1x100xf32>
    %11 = vector.broadcast %10 : vector<1x100xf32> to vector<2x100xf32>
    %12 = arith.addf %9, %11 : vector<2x100xf32>
    %cst_11 = arith.constant 0.000000e+00 : f32
    %13 = vector.broadcast %cst_11 : f32 to vector<2x100xf32>
    %14 = arith.maximumf %12, %13 : vector<2x100xf32>
    %c0_12 = arith.constant 0 : index
    %c0_13 = arith.constant 0 : index
    %15 = vector.load %arg5[%c0_12, %c0_13] : memref<100x2xf32, #tpu.memory_space<vmem>>, vector<100x2xf32>
    %cst_14 = arith.constant dense<0.000000e+00> : vector<2x2xf32>
    %16 = tpu.matmul %14, %15, %cst_14 {dimension_numbers = #tpu.dot_dimension_numbers<[1], [0], [0], [1], [0, 0, 1, 1], [], []>, precision = #tpu.contract_precision<fp32>} : vector<2x100xf32>, vector<100x2xf32>, vector<2x2xf32> -> vector<2x2xf32>
    %c0_15 = arith.constant 0 : index
    %c0_16 = arith.constant 0 : index
    %17 = vector.load %arg6[%c0_15, %c0_16] : memref<1x2xf32, #tpu.memory_space<vmem>>, vector<1x2xf32>
    %18 = vector.broadcast %17 : vector<1x2xf32> to vector<2x2xf32>
    %19 = arith.addf %16, %18 : vector<2x2xf32>
    %20 = vector.extract_strided_slice %19 {offsets = [0, 0], sizes = [2, 1], strides = [1, 1]} : vector<2x2xf32> to vector<2x1xf32>
    %21 = vector.extract_strided_slice %19 {offsets = [0, 1], sizes = [2, 1], strides = [1, 1]} : vector<2x2xf32> to vector<2x1xf32>
    %22 = arith.mulf %20, %21 : vector<2x1xf32>
    %c0_17 = arith.constant 0 : index
    %c0_18 = arith.constant 0 : index
    %23 = vector.load %arg7[%c0_17, %c0_18] : memref<2x1xf32, #tpu.memory_space<vmem>>, vector<2x1xf32>
    tpu.vector_store %arg7[%c0_17, %c0_18], %22 {strides = array<i32>} : memref<2x1xf32, #tpu.memory_space<vmem>>, vector<2x1xf32>,
    return
  }
}

</mosaic_0001>

<bundles_post_ra>
// kernel: neural_cf2_forward.1
= control target key start
LH: loop header
LB: loop body
LE: loop exit
PB: predicated region body
PF: predicated region fallthrough
CT: control target
= control target key end

     0   :  { %v3807_v3 = vmov 0.0   ;;  %vm55_vm0 = vcmask 523264   ;;  %vm740_vm1 = vcmask 588800   ;;  %vm1540_vm2 = vcmask 1043456   ;;  %s2422_s11 = smov 127   ;;  %s3768_s1 = inlined_call_operand.vmem [shape: f32[64,200], index: 1, kind: input, shape index: {}]   ;;  %s3769_s0 = inlined_call_operand.vmem [shape: f32[2,64], index: 0, kind: input, shape index: {}]   ;;  %s3770_s3 = inlined_call_operand.vmem [shape: f32[200,100], index: 3, kind: input, shape index: {}]   ;;  %s3771_s2 = inlined_call_operand.vmem [shape: f32[1,200], index: 2, kind: input, shape index: {}]   ;;  %s3772_s5 = inlined_call_operand.vmem [shape: f32[100,2], index: 5, kind: input, shape index: {}]   ;;  %s3773_s4 = inlined_call_operand.vmem [shape: f32[1,100], index: 4, kind: input, shape index: {}]   ;;  %s3774_s6 = inlined_call_operand.vmem [shape: f32[1,2], index: 6, kind: input, shape index: {}]   ;;  %s3775_s7 = inlined_call_operand.vmem [shape: f32[2,1], index: 7, kind: output, shape index: {}]  }
   0x1   :  { %v42_v0 = vld [vmem:[%s3768_s1 + $0x78] sm:$0xff]  ;;  %v41_v1 = vld [vmem:[%s3768_s1 + $0x70] sm:$0xff]  ;;  %v40_v2 = vld [vmem:[%s3768_s1 + $0x68] sm:$0xff]  ;;  %139 = vmatprep.mubr.f32.mxu0 %v3807_v3  ;;  %295 = vmatprep.mubr.f32.mxu1 %v3807_v3  ;;  %vm2421_vm3 = vmmov 0   ;;  %vm1536_vm4 = vcmask 818176   ;;  %vm2151_vm5 = vcmask 1024  }
   0x2   :  { %v2474_v4 = vand.u32 4294901760, %v42_v0  ;;  %v2476_v5 = vand.u32 4294901760, %v41_v1  ;;  %v2478_v6 = vand.u32 4294901760, %v40_v2  ;;  %v39_v7 = vld [vmem:[%s3768_s1 + $0x60] sm:$0xff]  ;;  %v38_v8 = vld [vmem:[%s3768_s1 + $0x58] sm:$0xff]  ;;  %v37_v9 = vld [vmem:[%s3768_s1 + $0x50] sm:$0xff] }
   0x3   :  { %v2489_v10 = vand.u32 4294901760, %v39_v7  ;;  %v2491_v11 = vand.u32 4294901760, %v38_v8  ;;  %v2493_v12 = vand.u32 4294901760, %v37_v9  ;;  %v36_v13 = vld [vmem:[%s3768_s1 + $0x48] sm:$0xff]  ;;  %v35_v14 = vld [vmem:[%s3768_s1 + $0x40] sm:$0xff]  ;;  %v34_v15 = vld [vmem:[%s3768_s1 + $0x38] sm:$0xff] }
   0x4   :  { %76 = vmatprep.subr.mxu0 %v2474_v4  ;;  %v2505_v16 = vand.u32 4294901760, %v36_v13  ;;  %v2507_v17 = vand.u32 4294901760, %v35_v14  ;;  %v2509_v18 = vand.u32 4294901760, %v34_v15  ;;  %v2512_v19 = vsub.f32 %v42_v0, %v2474_v4  ;;  %v33_v20 = vld [vmem:[%s3768_s1 + $0x30] sm:$0xff]  ;;  %v2520_v21 = vld [vmem:[%s3768_s1 + $0x28] sm:$0xff]  ;;  %v2525_v22 = vld [vmem:[%s3768_s1 + $0x20] sm:$0xff] }
   0x5   :  { %78 = vmatpush1.msra.mxu0 %v2476_v5  ;;  %v2528_v23 = vand.u32 4294901760, %v33_v20  ;;  %v2531_v24 = vsub.f32 %v41_v1, %v2476_v5  ;;  %v2534_v25 = vand.u32 4294901760, %v2520_v21  ;;  %v2537_v26 = vsub.f32 %v40_v2, %v2478_v6  ;;  %v2542_v27 = vld [vmem:[%s3768_s1 + $0x18] sm:$0xff]  ;;  %v2547_v28 = vld [vmem:[%s3768_s1 + $0x10] sm:$0xff]  ;;  %v2552_v29 = vld [vmem:[%s3768_s1 + $0x8] sm:$0xff] }
   0x6   :  { %80 = vmatprep.subr.mxu0 %v2478_v6  ;;  %v169_v30 = vand.u32 4294901760, %v2512_v19  ;;  %v2557_v31 = vand.u32 4294901760, %v2525_v22  ;;  %v2560_v32 = vsub.f32 %v39_v7, %v2489_v10  ;;  %v2563_v33 = vand.u32 4294901760, %v2542_v27  ;;  %v2577_v38 = vld [vmem:[%s3768_s1] sm:$0xff] }
   0x7   :  { %82 = vmatpush1.msra.mxu0 %v2489_v10  ;;  %v175_v34 = vand.u32 4294901760, %v2531_v24  ;;  %v181_v35 = vand.u32 4294901760, %v2537_v26  ;;  %v2569_v36 = vsub.f32 %v38_v8, %v2491_v11  ;;  %v2572_v37 = vand.u32 4294901760, %v2547_v28  ;;  %v26_v51 = vld [vmem:[%s3769_s0] sm:$0x3] }
   0x8   :  { %84 = vmatprep.subr.mxu0 %v2491_v11  ;;  %v170_v39 = vsub.f32 %v2512_v19, %v169_v30  ;;  %v187_v40 = vand.u32 4294901760, %v2560_v32  ;;  %v2585_v41 = vsub.f32 %v37_v9, %v2493_v12  ;;  %v2588_v42 = vand.u32 4294901760, %v2552_v29 }
   0x9   :  { %86 = vmatpush1.msra.mxu0 %v2493_v12  ;;  %v176_v43 = vsub.f32 %v2531_v24, %v175_v34  ;;  %v182_v44 = vsub.f32 %v2537_v26, %v181_v35  ;;  %v193_v45 = vand.u32 4294901760, %v2569_v36  ;;  %v2599_v46 = vsub.f32 %v36_v13, %v2505_v16 }
   0xa   :  { %88 = vmatprep.subr.mxu0 %v2505_v16  ;;  %v171_v47 = vand.u32 4294901760, %v170_v39  ;;  %v188_v48 = vsub.f32 %v2560_v32, %v187_v40  ;;  %v199_v49 = vand.u32 4294901760, %v2585_v41  ;;  %v2607_v50 = vand.u32 4294901760, %v2577_v38 }
   0xb   :  { %90 = vmatpush1.msra.mxu0 %v2507_v17  ;;  %v177_v52 = vand.u32 4294901760, %v176_v43  ;;  %v183_v53 = vand.u32 4294901760, %v182_v44  ;;  %v194_v54 = vsub.f32 %v2569_v36, %v193_v45  ;;  %v205_v55 = vand.u32 4294901760, %v2599_v46 }
   0xc   :  { %92 = vmatprep.subr.mxu0 %v2509_v18  ;;  %172 = vmatprep.subr.mxu1 %v171_v47  ;;  %v189_v56 = vand.u32 4294901760, %v188_v48  ;;  %v200_v57 = vsub.f32 %v2585_v41, %v199_v49  ;;  %v2622_v58 = vsub.f32 %v35_v14, %v2507_v17  ;;  %v2625_v59 = vsub.f32 %v34_v15, %v2509_v18 }
   0xd   :  { %94 = vmatpush1.msra.mxu0 %v2528_v23  ;;  %178 = vmatpush1.msra.mxu1 %v177_v52  ;;  %v195_v60 = vand.u32 4294901760, %v194_v54  ;;  %v206_v61 = vsub.f32 %v2599_v46, %v205_v55  ;;  %v57_v62 = vsel %vm55_vm0, %v26_v51, 0  ;;  %v2633_v63 = vsub.f32 %v33_v20, %v2528_v23 }
   0xe   :  { %96 = vmatprep.subr.mxu0 %v2534_v25  ;;  %184 = vmatprep.subr.mxu1 %v183_v53  ;;  %v201_v0 = vand.u32 4294901760, %v200_v57  ;;  %v211_v1 = vand.u32 4294901760, %v2622_v58  ;;  %v217_v2 = vand.u32 4294901760, %v2625_v59  ;;  %v2638_v7 = vand.u32 4294901760, %v57_v62 }
   0xf   :  { %98 = vmatpush1.msra.mxu0 %v2557_v31  ;;  %190 = vmatpush1.msra.mxu1 %v189_v56  ;;  %v207_v8 = vand.u32 4294901760, %v206_v61  ;;  %v223_v9 = vand.u32 4294901760, %v2633_v63  ;;  %v2644_v13 = vsub.f32 %v2520_v21, %v2534_v25  ;;  %v2648_v14 = vsub.f32 %v2525_v22, %v2557_v31 }
  0x10   :  { %100 = vmatprep.subr.mxu0 %v2563_v33  ;;  %196 = vmatprep.subr.mxu1 %v195_v60  ;;  %v212_v15 = vsub.f32 %v2622_v58, %v211_v1  ;;  %v218_v20 = vsub.f32 %v2625_v59, %v217_v2  ;;  %v2658_v39 = vsub.f32 %v57_v62, %v2638_v7 }
  0x11   :  { %102 = vmatpush1.msra.mxu0 %v2572_v37  ;;  %202 = vmatpush1.msra.mxu1 %v201_v0  ;;  %v224_v21 = vsub.f32 %v2633_v63, %v223_v9  ;;  %v229_v22 = vand.u32 4294901760, %v2644_v13  ;;  %v235_v43 = vand.u32 4294901760, %v2648_v14  ;;  %v2668_v44 = vsub.f32 %v2542_v27, %v2563_v33 }
  0x12   :  { %104 = vmatprep.subr.mxu0 %v2588_v42  ;;  %208 = vmatprep.subr.mxu1 %v207_v8  ;;  %v213_v47 = vand.u32 4294901760, %v212_v15  ;;  %v219_v48 = vand.u32 4294901760, %v218_v20  ;;  %v142_v51 = vand.u32 4294901760, %v2658_v39  ;;  %v2674_v52 = vsub.f32 %v2547_v28, %v2572_v37 }
  0x13   :  { %106 = vmatpush1.msra.mxu0 %v2607_v50  ;;  %v225_v53 = vand.u32 4294901760, %v224_v21  ;;  %v230_v54 = vsub.f32 %v2644_v13, %v229_v22  ;;  %v236_v27 = vsub.f32 %v2648_v14, %v235_v43  ;;  %v241_v56 = vand.u32 4294901760, %v2668_v44 }
  0x14   :  { %214 = vmatpush1.msra.mxu1 %v213_v47  ;;  %321 = vmatprep.subr.mxu0 %v2512_v19  ;;  %v143_v28 = vsub.f32 %v2658_v39, %v142_v51  ;;  %v247_v57 = vand.u32 4294901760, %v2674_v52  ;;  %v2691_v60 = vsub.f32 %v2552_v29, %v2588_v42  ;;  %v2695_v61 = vsub.f32 %v2577_v38, %v2607_v50  ;;  %v723_v19 = vld [vmem:[%s3770_s3 + $0x78] sm:$0xff] }
  0x15   :  { %220 = vmatprep.subr.mxu1 %v219_v48  ;;  %v231_v62 = vand.u32 4294901760, %v230_v54  ;;  %v237_v0 = vand.u32 4294901760, %v236_v27  ;;  %v242_v8 = vsub.f32 %v2668_v44, %v241_v56 }
  0x16   :  { %v144_v15 = vand.u32 4294901760, %v143_v28  ;;  %226 = vmatpush1.msra.mxu1 %v225_v53  ;;  %v248_v20 = vsub.f32 %v2674_v52, %v247_v57  ;;  %v253_v29 = vand.u32 4294901760, %v2691_v60  ;;  %v259_v21 = vand.u32 4294901760, %v2695_v61 }
  0x17   :  { %232 = vmatprep.subr.mxu1 %v231_v62  ;;  %v243_v38 = vand.u32 4294901760, %v242_v8  ;;  %v713_v62 = vld [vmem:[%s3770_s3 + $0x28] sm:$0xff] }
  0x18   :  { %145 = vmatmul.mubr.f32.vlgmr.msra.gmra.mxu0 %v144_v15  ;;  %238 = vmatpush1.msra.mxu1 %v237_v0  ;;  %v249_v47 = vand.u32 4294901760, %v248_v20  ;;  %v254_v48 = vsub.f32 %v2691_v60, %v253_v29  ;;  %v260_v53 = vsub.f32 %v2695_v61, %v259_v21 }
  0x19   :  { %324 = vmatpush1.msra.mxu0 %v2531_v24  ;;  %244 = vmatprep.subr.mxu1 %v243_v38  ;;  %v722_v24 = vld [vmem:[%s3770_s3 + $0x70] sm:$0xff] }
  0x1a   :  { %327 = vmatprep.subr.mxu0 %v2537_v26  ;;  %250 = vmatpush1.msra.mxu1 %v249_v47  ;;  %v255_v54 = vand.u32 4294901760, %v254_v48  ;;  %v261_v27 = vand.u32 4294901760, %v260_v53  ;;  %v2766_v26 = vand.u32 4294901760, %v723_v19 }
  0x1b   :  { %330 = vmatpush1.msra.mxu0 %v2560_v32  ;;  %399 = vmatprep.mubr.f32.mxu0 %v3807_v3 }
  0x1c   :  { %333 = vmatprep.subr.mxu0 %v2569_v36  ;;  %256 = vmatprep.subr.mxu1 %v255_v54  ;;  %v2784_v32 = vsub.f32 %v723_v19, %v2766_v26 }
  0x1d   :  { %336 = vmatpush1.msra.mxu0 %v2585_v41  ;;  %262 = vmatpush1.msra.mxu1 %v261_v27  ;;  %v711_v27 = vld [vmem:[%s3770_s3 + $0x18] sm:$0xff] }
  0x1e   :  { %339 = vmatprep.subr.mxu0 %v2599_v46  ;;  %297 = vmatmul.mubr.f32.vlgmr.msra.gmra.mxu1 %v2638_v7  ;;  %v717_v46 = vld [vmem:[%s3770_s3 + $0x48] sm:$0xff] }
  0x1f   :  { %342 = vmatpush1.msra.mxu0 %v2622_v58  ;;  %425 = vmatprep.subr.mxu1 %v2474_v4  ;;  %v2879_v58 = vand.u32 4294901760, %v717_v46 }
  0x20   :  { %345 = vmatprep.subr.mxu0 %v2625_v59  ;;  %427 = vmatpush1.msra.mxu1 %v2476_v5 }
  0x21   :  { %348 = vmatpush1.msra.mxu0 %v2633_v63  ;;  %429 = vmatprep.subr.mxu1 %v2478_v6  ;;  %v716_v63 = vld [vmem:[%s3770_s3 + $0x40] sm:$0xff] }
  0x22   :  { %351 = vmatprep.subr.mxu0 %v2644_v13  ;;  %431 = vmatpush1.msra.mxu1 %v2489_v10 }
  0x23   :  { %354 = vmatpush1.msra.mxu0 %v2648_v14  ;;  %433 = vmatprep.subr.mxu1 %v2491_v11  ;;  %v715_v14 = vld [vmem:[%s3770_s3 + $0x38] sm:$0xff] }
  0x24   :  { %357 = vmatprep.subr.mxu0 %v2668_v44  ;;  %435 = vmatpush1.msra.mxu1 %v2493_v12  ;;  %v2907_v44 = vand.u32 4294901760, %v715_v14 }
  0x25   :  { %360 = vmatpush1.msra.mxu0 %v2674_v52  ;;  %437 = vmatprep.subr.mxu1 %v2505_v16  ;;  %v714_v52 = vld [vmem:[%s3770_s3 + $0x30] sm:$0xff] }
  0x26   :  { %363 = vmatprep.subr.mxu0 %v2691_v60  ;;  %439 = vmatpush1.msra.mxu1 %v2507_v17  ;;  %v2925_v60 = vand.u32 4294901760, %v714_v52 }
  0x27   :  { %366 = vmatpush1.msra.mxu0 %v2695_v61  ;;  %441 = vmatprep.subr.mxu1 %v2509_v18 }
  0x28   :  { %402 = vmatmul.mubr.f32.vlgmr.msra.gmra.mxu0 %v2658_v39  ;;  %517 = vmatprep.subr.mxu0 %v169_v30  ;;  %v2775_v30 = vand.u32 4294901760, %v722_v24  ;;  %v2938_v20 = vsub.f32 %v714_v52, %v2925_v60 }
  0x29   :  { %443 = vmatpush1.msra.mxu1 %v2528_v23  ;;  %521 = vmatpush1.msra.mxu0 %v175_v34 }
  0x2a   :  { %445 = vmatprep.subr.mxu1 %v2534_v25  ;;  %525 = vmatprep.subr.mxu0 %v181_v35  ;;  %v3785_v48 = vand.u32 4294901760, %v2938_v20 }
  0x2b   :  { %447 = vmatpush1.msra.mxu1 %v2557_v31  ;;  %529 = vmatpush1.msra.mxu0 %v187_v40 }
  0x2c   :  { %449 = vmatprep.subr.mxu1 %v2563_v33  ;;  %533 = vmatprep.subr.mxu0 %v193_v45 }
  0x2d   :  { %451 = vmatpush1.msra.mxu1 %v2572_v37  ;;  %537 = vmatpush1.msra.mxu0 %v199_v49 }
  0x2e   :  { %453 = vmatprep.subr.mxu1 %v2588_v42  ;;  %541 = vmatprep.subr.mxu0 %v205_v55 }
  0x2f   :  { %455 = vmatpush1.msra.mxu1 %v2607_v50  ;;  %488 = vmatprep.mubr.f32.mxu1 %v3807_v3 }
  0x30   :  { %545 = vmatpush1.msra.mxu0 %v211_v1  ;;  %492 = vmatmul.mubr.f32.vlgmr.msra.gmra.mxu1 %v142_v51 }
  0x31   :  { %549 = vmatprep.subr.mxu0 %v217_v2  ;;  %635 = vmatprep.subr.mxu1 %v2474_v4  ;;  %v2793_v4 = vsub.f32 %v722_v24, %v2775_v30  ;;  %v916_v24 = vsub.f32 %v2938_v20, %v3785_v48  ;;  %v725_v48 = vld [vmem:[%s3770_s3 + $0x88] sm:$0xff] }
  0x32   :  { %553 = vmatpush1.msra.mxu0 %v223_v9  ;;  %637 = vmatpush1.msra.mxu1 %v2476_v5  ;;  %v3800_v5 = vand.u32 4294901760, %v2784_v32  ;;  %v2894_v9 = vand.u32 4294901760, %v716_v63 }
  0x33   :  { %557 = vmatprep.subr.mxu0 %v229_v22  ;;  %639 = vmatprep.subr.mxu1 %v2478_v6  ;;  %v3799_v6 = vand.u32 4294901760, %v2793_v4 }
  0x34   :  { %561 = vmatpush1.msra.mxu0 %v235_v43  ;;  %641 = vmatpush1.msra.mxu1 %v2489_v10  ;;  %v853_v10 = vsub.f32 %v2784_v32, %v3800_v5  ;;  %v2905_v43 = vsub.f32 %v716_v63, %v2894_v9 }
  0x35   :  { %565 = vmatprep.subr.mxu0 %v241_v56  ;;  %643 = vmatprep.subr.mxu1 %v2491_v11  ;;  %v860_v11 = vsub.f32 %v2793_v4, %v3799_v6 }
  0x36   :  { %569 = vmatpush1.msra.mxu0 %v247_v57  ;;  %645 = vmatpush1.msra.mxu1 %v2493_v12  ;;  %v854_v12 = vand.u32 4294901760, %v853_v10  ;;  %v3788_v28 = vand.u32 4294901760, %v2905_v43  ;;  %v2923_v57 = vsub.f32 %v715_v14, %v2907_v44  ;;  %v708_v14 = vld [vmem:[%s3770_s3] sm:$0xff] }
  0x37   :  { %573 = vmatprep.subr.mxu0 %v253_v29  ;;  %647 = vmatprep.subr.mxu1 %v2505_v16  ;;  %v861_v16 = vand.u32 4294901760, %v860_v11  ;;  %v2941_v29 = vand.u32 4294901760, %v713_v62  ;;  %v2969_v11 = vand.u32 4294901760, %v711_v27 }
  0x38   :  { %577 = vmatpush1.msra.mxu0 %v259_v21  ;;  %610 = vmatprep.mubr.f32.mxu0 %v3807_v3  ;;  %v902_v8 = vsub.f32 %v2905_v43, %v3788_v28  ;;  %v3787_v15 = vand.u32 4294901760, %v2923_v57  ;;  %v712_v21 = vld [vmem:[%s3770_s3 + $0x20] sm:$0xff] }
  0x39   :  { %649 = vmatpush1.msra.mxu1 %v2507_v17  ;;  %612 = vmatmul.mubr.f32.vlgmr.msra.gmra.mxu0 %v2638_v7  ;;  %v721_v17 = vld [vmem:[%s3770_s3 + $0x68] sm:$0xff]  ;;  %v2952_v53 = vand.u32 4294901760, %v712_v21  ;;  %v2956_v54 = vsub.f32 %v713_v62, %v2941_v29  ;;  %v732_v62 = vld [vmem:[%s3770_s3 + $0xc0] sm:$0xff] }
  0x3a   :  { %651 = vmatprep.subr.mxu1 %v2509_v18  ;;  %698 = vmatprep.mubr.f32.mxu1 %v3807_v3  ;;  %v2835_v18 = vand.u32 4294901760, %v721_v17  ;;  %v903_v38 = vand.u32 4294901760, %v902_v8  ;;  %v909_v47 = vsub.f32 %v2923_v57, %v3787_v15  ;;  %v3132_v15 = vand.u32 4294901760, %v725_v48  ;;  %v724_v28 = vld [vmem:[%s3770_s3 + $0x80] sm:$0xff] }
  0x3b   :  { %653 = vmatpush1.msra.mxu1 %v2528_v23  ;;  %744 = vmatprep.subr.mxu0 %v3807_v3  ;;  %v720_v23 = vld [vmem:[%s3770_s3 + $0x60] sm:$0xff]  ;;  %v2967_v10 = vsub.f32 %v712_v21, %v2952_v53 }
  0x3c   :  { %655 = vmatprep.subr.mxu1 %v2534_v25  ;;  %746 = vmatpush1.msra.mxu0 %v2766_v26  ;;  %v2841_v25 = vsub.f32 %v721_v17, %v2835_v18  ;;  %v910_v19 = vand.u32 4294901760, %v909_v47  ;;  %v917_v17 = vand.u32 4294901760, %v916_v24  ;;  %3835 = vst [vmem:[#allocation10_spill] sm:$0xff] %v3132_v15 }
  0x3d   :  { %657 = vmatpush1.msra.mxu1 %v2557_v31  ;;  %747 = vmatprep.subr.mxu0 %v3807_v3  ;;  %v2843_v31 = vand.u32 4294901760, %v720_v23 }
  0x3e   :  { %659 = vmatprep.subr.mxu1 %v2563_v33  ;;  %749 = vmatpush1.msra.mxu0 %v2775_v30  ;;  %v719_v33 = vld [vmem:[%s3770_s3 + $0x58] sm:$0xff]  ;;  %v3797_v34 = vand.u32 4294901760, %v2841_v25 }
  0x3f   :  { %661 = vmatpush1.msra.mxu1 %v2572_v37  ;;  %750 = vmatprep.subr.mxu0 %v3807_v3  ;;  %v2852_v35 = vsub.f32 %v720_v23, %v2843_v31  ;;  %v2854_v36 = vand.u32 4294901760, %v719_v33  ;;  %v718_v37 = vld [vmem:[%s3770_s3 + $0x50] sm:$0xff]  ;;  %v3782_v23 = vand.u32 4294901760, %v2967_v10 }
  0x40   :  { %663 = vmatprep.subr.mxu1 %v2588_v42  ;;  %752 = vmatpush1.msra.mxu0 %v2835_v18  ;;  %v867_v40 = vsub.f32 %v2841_v25, %v3797_v34  ;;  %v2869_v45 = vand.u32 4294901760, %v718_v37 }
  0x41   :  { %665 = vmatpush1.msra.mxu1 %v2607_v50  ;;  %753 = vmatprep.subr.mxu0 %v3807_v3  ;;  %v3796_v41 = vand.u32 4294901760, %v2852_v35  ;;  %v2866_v42 = vsub.f32 %v719_v33, %v2854_v36  ;;  %v2980_v33 = vsub.f32 %v711_v27, %v2969_v11  ;;  %v731_v27 = vld [vmem:[%s3770_s3 + $0xb8] sm:$0xff] }
  0x42   :  { %700 = vmatmul.mubr.f32.vlgmr.msra.gmra.mxu1 %v2638_v7  ;;  %849 = vmatprep.subr.mxu1 %v3807_v3  ;;  %v868_v49 = vand.u32 4294901760, %v867_v40  ;;  %v2882_v59 = vsub.f32 %v718_v37, %v2869_v45  ;;  %v2892_v7 = vsub.f32 %v717_v46, %v2879_v58  ;;  %v709_v46 = vld [vmem:[%s3770_s3 + $0x8] sm:$0xff] }
  0x43   :  { %855 = vmatpush1.msra.mxu1 %v854_v12  ;;  %755 = vmatpush1.msra.mxu0 %v2843_v31  ;;  %v874_v50 = vsub.f32 %v2852_v35, %v3796_v41  ;;  %v3793_v55 = vand.u32 4294901760, %v2866_v42  ;;  %v3784_v12 = vand.u32 4294901760, %v2956_v54 }
  0x44   :  { %856 = vmatprep.subr.mxu1 %v3807_v3  ;;  %756 = vmatprep.subr.mxu0 %v3807_v3  ;;  %v3791_v13 = vand.u32 4294901760, %v2882_v59  ;;  %v3789_v22 = vand.u32 4294901760, %v2892_v7 }
  0x45   :  { %862 = vmatpush1.msra.mxu1 %v861_v16  ;;  %758 = vmatpush1.msra.mxu0 %v2854_v36  ;;  %v875_v1 = vand.u32 4294901760, %v874_v50  ;;  %v881_v2 = vsub.f32 %v2866_v42, %v3793_v55  ;;  %v710_v16 = vld [vmem:[%s3770_s3 + $0x10] sm:$0xff]  ;;  %v923_v40 = vsub.f32 %v2956_v54, %v3784_v12  ;;  %v3781_v50 = vand.u32 4294901760, %v2980_v33 }
  0x46   :  { %863 = vmatprep.subr.mxu1 %v3807_v3  ;;  %759 = vmatprep.subr.mxu0 %v3807_v3  ;;  %v888_v51 = vsub.f32 %v2882_v59, %v3791_v13  ;;  %v895_v56 = vsub.f32 %v2892_v7, %v3789_v22  ;;  %v2982_v37 = vand.u32 4294901760, %v710_v16  ;;  %v3150_v22 = vand.u32 4294901760, %v724_v28 }
  0x47   :  { %761 = vmatpush1.msra.mxu0 %v2869_v45  ;;  %869 = vmatpush1.msra.mxu1 %v868_v49  ;;  %v882_v39 = vand.u32 4294901760, %v881_v2  ;;  %v930_v49 = vsub.f32 %v2967_v10, %v3782_v23  ;;  %v924_v2 = vand.u32 4294901760, %v923_v40  ;;  %v726_v23 = vld [vmem:[%s3770_s3 + $0x90] sm:$0xff] }
  0x48   :  { %762 = vmatprep.subr.mxu0 %v3807_v3  ;;  %870 = vmatprep.subr.mxu1 %v3807_v3  ;;  %v889_v61 = vand.u32 4294901760, %v888_v51  ;;  %v896_v0 = vand.u32 4294901760, %v895_v56  ;;  %v2998_v63 = vsub.f32 %v710_v16, %v2982_v37  ;;  %v937_v51 = vsub.f32 %v2980_v33, %v3781_v50  ;;  %3837 = vst [vmem:[#allocation12_spill] sm:$0xff] %v3150_v22 }
  0x49   :  { %764 = vmatpush1.msra.mxu0 %v2879_v58  ;;  %876 = vmatpush1.msra.mxu1 %v875_v1  ;;  %v3000_v1 = vand.u32 4294901760, %v709_v46 }
  0x4a   :  { %765 = vmatprep.subr.mxu0 %v3807_v3  ;;  %877 = vmatprep.subr.mxu1 %v3807_v3  ;;  %v3779_v52 = vand.u32 4294901760, %v2998_v63 }
  0x4b   :  { %767 = vmatpush1.msra.mxu0 %v2894_v9  ;;  %883 = vmatpush1.msra.mxu1 %v882_v39  ;;  %v931_v39 = vand.u32 4294901760, %v930_v49  ;;  %v3013_v56 = vsub.f32 %v709_v46, %v3000_v1  ;;  %v730_v46 = vld [vmem:[%s3770_s3 + $0xb0] sm:$0xff] }
  0x4c   :  { %768 = vmatprep.subr.mxu0 %v3807_v3  ;;  %884 = vmatprep.subr.mxu1 %v3807_v3  ;;  %v944_v8 = vsub.f32 %v2998_v63, %v3779_v52 }
  0x4d   :  { %770 = vmatpush1.msra.mxu0 %v2907_v44  ;;  %890 = vmatpush1.msra.mxu1 %v889_v61  ;;  %v3016_v61 = vand.u32 4294901760, %v708_v14  ;;  %v3778_v21 = vand.u32 4294901760, %v3013_v56 }
  0x4e   :  { %771 = vmatprep.subr.mxu0 %v3807_v3  ;;  %891 = vmatprep.subr.mxu1 %v3807_v3 }
  0x4f   :  { %773 = vmatpush1.msra.mxu0 %v2925_v60  ;;  %897 = vmatpush1.msra.mxu1 %v896_v0  ;;  %v938_v0 = vand.u32 4294901760, %v937_v51  ;;  %v3031_v47 = vsub.f32 %v708_v14, %v3016_v61  ;;  %v951_v24 = vsub.f32 %v3013_v56, %v3778_v21 }
  0x50   :  { %774 = vmatprep.subr.mxu0 %v3807_v3  ;;  %898 = vmatprep.subr.mxu1 %v3807_v3 }
  0x51   :  { %776 = vmatpush1.msra.mxu0 %v2941_v29  ;;  %904 = vmatpush1.msra.mxu1 %v903_v38  ;;  %v3027_v38 = vand.u32 4294901760, %v732_v62  ;;  %v3776_v40 = vand.u32 4294901760, %v3031_v47  ;;  %v952_v49 = vand.u32 4294901760, %v951_v24 }
  0x52   :  { %777 = vmatprep.subr.mxu0 %v3807_v3  ;;  %905 = vmatprep.subr.mxu1 %v3807_v3 }
  0x53   :  { %779 = vmatpush1.msra.mxu0 %v2952_v53  ;;  %911 = vmatpush1.msra.mxu1 %v910_v19  ;;  %v945_v19 = vand.u32 4294901760, %v944_v8  ;;  %v3042_v16 = vsub.f32 %v732_v62, %v3027_v38  ;;  %v958_v51 = vsub.f32 %v3031_v47, %v3776_v40  ;;  %v729_v62 = vld [vmem:[%s3770_s3 + $0xa8] sm:$0xff]  ;;  %v728_v40 = vld [vmem:[%s3770_s3 + $0xa0] sm:$0xff] }
  0x54   :  { %780 = vmatprep.subr.mxu0 %v3807_v3  ;;  %912 = vmatprep.subr.mxu1 %v3807_v3 }
  0x55   :  { %782 = vmatpush1.msra.mxu0 %v2969_v11  ;;  %918 = vmatpush1.msra.mxu1 %v917_v17  ;;  %v3044_v17 = vand.u32 4294901760, %v731_v27  ;;  %v959_v24 = vand.u32 4294901760, %v958_v51  ;;  %v727_v51 = vld [vmem:[%s3770_s3 + $0x98] sm:$0xff] }
  0x56   :  { %783 = vmatprep.subr.mxu0 %v3807_v3  ;;  %919 = vmatprep.subr.mxu1 %v3807_v3  ;;  %v3102_v50 = vand.u32 4294901760, %v727_v51 }
  0x57   :  { %785 = vmatpush1.msra.mxu0 %v2982_v37  ;;  %925 = vmatpush1.msra.mxu1 %v924_v2  ;;  %v3777_v2 = vand.u32 4294901760, %v3042_v16  ;;  %v3055_v14 = vsub.f32 %v731_v27, %v3044_v17 }
  0x58   :  { %786 = vmatprep.subr.mxu0 %v3807_v3  ;;  %926 = vmatprep.subr.mxu1 %v3807_v3  ;;  %3830 = vst [vmem:[#allocation5_spill] sm:$0xff] %v3102_v50  ;;  %v3117_v12 = vsub.f32 %v727_v51, %v3102_v50 }
  0x59   :  { %788 = vmatpush1.msra.mxu0 %v3000_v1  ;;  %932 = vmatpush1.msra.mxu1 %v931_v39  ;;  %3827 = vst [vmem:[#allocation2_spill] sm:$0xff] %v3055_v14  ;;  %v3057_v39 = vand.u32 4294901760, %v730_v46  ;;  %v3780_v8 = vand.u32 4294901760, %v3055_v14 }
  0x5a   :  { %789 = vmatprep.subr.mxu0 %v3807_v3  ;;  %933 = vmatprep.subr.mxu1 %v3807_v3  ;;  %3832 = vst [vmem:[#allocation7_spill] sm:$0xff] %v3117_v12 }
  0x5b   :  { %791 = vmatpush1.msra.mxu0 %v3016_v61  ;;  %939 = vmatpush1.msra.mxu1 %v938_v0  ;;  %v979_v0 = vsub.f32 %v3042_v16, %v3777_v2  ;;  %v3073_v27 = vsub.f32 %v730_v46, %v3057_v39  ;;  %v986_v46 = vsub.f32 %v3055_v14, %v3780_v8 }
  0x5c   :  { %806 = vmatprep.subr.mxu0 %v3807_v3  ;;  %940 = vmatprep.subr.mxu1 %v3807_v3 }
  0x5d   :  { %808 = vmatpush2.msra.mxu0 %v3027_v38  ;;  %946 = vmatpush1.msra.mxu1 %v945_v19  ;;  %3828 = vst [vmem:[#allocation3_spill] sm:$0xff] %v3073_v27  ;;  %v3075_v19 = vand.u32 4294901760, %v729_v62  ;;  %v980_v2 = vand.u32 4294901760, %v979_v0  ;;  %v3783_v21 = vand.u32 4294901760, %v3073_v27  ;;  %v987_v0 = vand.u32 4294901760, %v986_v46 }
  0x5e   :  { %809 = vmatprep.subr.mxu0 %v3807_v3  ;;  %947 = vmatprep.subr.mxu1 %v3807_v3 }
  0x5f   :  { %811 = vmatpush2.msra.mxu0 %v3044_v17  ;;  %953 = vmatpush1.msra.mxu1 %v952_v49  ;;  %v3088_v52 = vsub.f32 %v729_v62, %v3075_v19  ;;  %v3091_v49 = vand.u32 4294901760, %v728_v40  ;;  %v993_v8 = vsub.f32 %v3073_v27, %v3783_v21 }
  0x60   :  { %812 = vmatprep.subr.mxu0 %v3807_v3  ;;  %954 = vmatprep.subr.mxu1 %v3807_v3 }
  0x61   :  { %814 = vmatpush2.msra.mxu0 %v3057_v39  ;;  %3829 = vst [vmem:[#allocation4_spill] sm:$0xff] %v3088_v52  ;;  %960 = vmatpush1.msra.mxu1 %v959_v24  ;;  %v3786_v62 = vand.u32 4294901760, %v3088_v52  ;;  %v3106_v24 = vsub.f32 %v728_v40, %v3091_v49  ;;  %v994_v46 = vand.u32 4294901760, %v993_v8 }
  0x62   :  { %815 = vmatprep.subr.mxu0 %v3807_v3  ;;  %975 = vmatprep.subr.mxu1 %v3807_v3 }
  0x63   :  { %817 = vmatpush2.msra.mxu0 %v3075_v19  ;;  %981 = vmatpush2.msra.mxu1 %v980_v2  ;;  %3831 = vst [vmem:[#allocation6_spill] sm:$0xff] %v3106_v24  ;;  %v1000_v21 = vsub.f32 %v3088_v52, %v3786_v62  ;;  %v3119_v2 = vand.u32 4294901760, %v726_v23  ;;  %v3790_v40 = vand.u32 4294901760, %v3106_v24  ;;  %v3792_v62 = vand.u32 4294901760, %v3117_v12 }
  0x64   :  { %818 = vmatprep.subr.mxu0 %v3807_v3  ;;  %982 = vmatprep.subr.mxu1 %v3807_v3 }
  0x65   :  { %820 = vmatpush2.msra.mxu0 %v3091_v49  ;;  %3833 = vst [vmem:[#allocation8_spill] sm:$0xff] %v3119_v2  ;;  %988 = vmatpush2.msra.mxu1 %v987_v0  ;;  %v1001_v8 = vand.u32 4294901760, %v1000_v21  ;;  %v3130_v51 = vsub.f32 %v726_v23, %v3119_v2  ;;  %v1007_v0 = vsub.f32 %v3106_v24, %v3790_v40 }
  0x66   :  { %821 = vmatprep.subr.mxu0 %v3807_v3  ;;  %989 = vmatprep.subr.mxu1 %v3807_v3  ;;  %v1014_v23 = vsub.f32 %v3117_v12, %v3792_v62 }
  0x67   :  { %823 = vmatpush2.msra.mxu0 %v3102_v50  ;;  %3834 = vst [vmem:[#allocation9_spill] sm:$0xff] %v3130_v51  ;;  %995 = vmatpush2.msra.mxu1 %v994_v46  ;;  %v3795_v21 = vand.u32 4294901760, %v3130_v51  ;;  %v3148_v46 = vsub.f32 %v725_v48, %v3132_v15  ;;  %v1008_v40 = vand.u32 4294901760, %v1007_v0  ;;  %v3160_v48 = vsub.f32 %v724_v28, %v3150_v22 }
  0x68   :  { %824 = vmatprep.subr.mxu0 %v3807_v3  ;;  %996 = vmatprep.subr.mxu1 %v3807_v3  ;;  %v1015_v13 = vand.u32 4294901760, %v1014_v23 }
  0x69   :  { %826 = vmatpush2.msra.mxu0 %v3119_v2  ;;  %3836 = vst [vmem:[#allocation11_spill] sm:$0xff] %v3148_v46  ;;  %1002 = vmatpush2.msra.mxu1 %v1001_v8  ;;  %v1021_v62 = vsub.f32 %v3130_v51, %v3795_v21  ;;  %v3794_v55 = vand.u32 4294901760, %v3148_v46  ;;  %3838 = vst [vmem:[#allocation13_spill] sm:$0xff] %v3160_v48  ;;  %v3798_v23 = vand.u32 4294901760, %v3160_v48 }
  0x6a   :  { %827 = vmatprep.subr.mxu0 %v3807_v3  ;;  %1003 = vmatprep.subr.mxu1 %v3807_v3 }
  0x6b   :  { %829 = vmatpush2.msra.mxu0 %v3132_v15  ;;  %1009 = vmatpush2.msra.mxu1 %v1008_v40  ;;  %v1022_v8 = vand.u32 4294901760, %v1021_v62  ;;  %v1028_v0 = vsub.f32 %v3148_v46, %v3794_v55  ;;  %v1035_v40 = vsub.f32 %v3160_v48, %v3798_v23  ;;  %v45_v55 = vlaneseq }
  0x6c   :  { %830 = vmatprep.subr.mxu0 %v3807_v3  ;;  %1010 = vmatprep.subr.mxu1 %v3807_v3 }
  0x6d   :  { %832 = vmatpush2.msra.mxu0 %v3150_v22  ;;  %1016 = vmatpush2.msra.mxu1 %v1015_v13  ;;  %v1029_v28 = vand.u32 4294901760, %v1028_v0  ;;  %v1036_v62 = vand.u32 4294901760, %v1035_v40  ;;  %v46_v21 = vshrl.u32 %v45_v55, 7  ;;  %v43_v0 = vld [vmem:[%s3771_s2] sm:$0x3] }
  0x6e   :  { %1046 = vmatprep.subr.mxu0 %v3807_v3  ;;  %1017 = vmatprep.subr.mxu1 %v3807_v3 }
  0x6f   :  { %1023 = vmatpush2.msra.mxu1 %v1022_v8  ;;  %v47_v13 = vsub.s32 0, %v46_v21  ;;  %v51_v34 = vsub.s32 1, %v46_v21 }
  0x70   :  { %1024 = vmatprep.subr.mxu1 %v3807_v3 }
  0x71   :  { %1030 = vmatpush2.msra.mxu1 %v1029_v28  ;;  %v48_v23 = vrot.slane %v43_v0, %v47_v13  ;;  %v52_v5 = vrot.slane %v43_v0, %v51_v34 }
  0x72   :  { %1031 = vmatprep.subr.mxu1 %v3807_v3 }
  0x73   :  { %1037 = vmatpush2.msra.mxu1 %v1036_v62 }
  0x74   :  { %1170 = vmatprep.subr.mxu1 %v3807_v3 }
  0xd8   :  { %v146_v41 = vpop.f32.mrf.mxu0 }
  0xd9   :  { %v147_v28 = vadd.f32 %v146_v41, %v48_v23 }
  0xda   :  { %v148_v8 = vpop.f32.mrf.mxu0 }
  0xdb   :  { %v149_v46 = vadd.f32 %v148_v8, %v52_v5  ;;  %v3843_v8 = vld [vmem:[#allocation8_spill] sm:$0xff] }
  0xde   :  { %v298_v6 = vpop.f32.mrf.mxu1 }
  0xdf   :  { %v299_v3 = vadd.f32 %v298_v6, %v147_v28  ;;  %v3845_v28 = vld [vmem:[#allocation10_spill] sm:$0xff] }
  0xe0   :  { %v300_v48 = vpop.f32.mrf.mxu1 }
  0xe1   :  { %v301_v55 = vadd.f32 %v300_v48, %v149_v46  ;;  %v3842_v48 = vld [vmem:[#allocation3_spill] sm:$0xff] }
  0xe8   :  { %v403_v40 = vpop.f32.mrf.mxu0 }
  0xe9   :  { %v404_v22 = vadd.f32 %v403_v40, %v299_v3  ;;  %v3844_v40 = vld [vmem:[#allocation4_spill] sm:$0xff] }
  0xea   :  { %v405_v62 = vpop.f32.mrf.mxu0 }
  0xeb   :  { %v406_v15 = vadd.f32 %v405_v62, %v301_v55  ;;  %v3846_v62 = vld [vmem:[#allocation6_spill] sm:$0xff]  ;;  %v3847_v55 = vld [vmem:[#allocation12_spill] sm:$0xff] }
  0xf0   :  { %v493_v51 = vpop.f32.mrf.mxu1 }
  0xf1   :  { %v494_v52 = vadd.f32 %v493_v51, %v404_v22  ;;  %v3841_v51 = vld [vmem:[#allocation5_spill] sm:$0xff] }
  0xf2   :  { %v495_v24 = vpop.f32.mrf.mxu1 }
  0xf3   :  { %v496_v27 = vadd.f32 %v495_v24, %v406_v15 }
  0xf9   :  { %v613_v12 = vpop.f32.mrf.mxu0 }
  0xfa   :  { %v614_v21 = vadd.f32 %v613_v12, %v494_v52  ;;  %v3839_v52 = vmov 0.0  }
  0xfb   :  { %v615_v2 = vpop.f32.mrf.mxu0 }
  0xfc   :  { %v616_v50 = vadd.f32 %v615_v2, %v496_v27  ;;  %v3840_v2 = vld [vmem:[#allocation2_spill] sm:$0xff] }
 0x102   :  { %v701_v13 = vpop.f32.mrf.mxu1 }
 0x103   :  { %v702_v14 = vadd.f32 %v701_v13, %v614_v21  ;;  %v3848_v21 = vld [vmem:[#allocation7_spill] sm:$0xff]  ;;  %v3849_v13 = vld [vmem:[#allocation9_spill] sm:$0xff] }
 0x104   :  { %v703_v34 = vpop.f32.mrf.mxu1 }
 0x105   :  { %v706_v0 = vmax.f32 %v702_v14, 0.0  ;;  %v704_v41 = vadd.f32 %v703_v34, %v616_v50  ;;  %v3850_v34 = vld [vmem:[#allocation11_spill] sm:$0xff] }
 0x107   :  { %v3180_v5 = vand.u32 4294901760, %v706_v0  ;;  %v707_v23 = vmax.f32 %v704_v41, 0.0 }
 0x109   :  { %v3183_v6 = vsub.f32 %v706_v0, %v3180_v5  ;;  %v742_v3 = vsel %vm740_vm1, %v707_v23, 0 }
 0x10a   :  { %v3185_v46 = vand.u32 4294901760, %v742_v3 }
 0x10b   :  { %v841_v22 = vand.u32 4294901760, %v3183_v6 }
 0x10c   :  { %v834_v15 = vsub.f32 %v742_v3, %v3185_v46  ;;  %1039 = vmatprep.mubr.f32.mxu1 %v3185_v46 }
 0x10d   :  { %1041 = vmatmul.mubr.f32.vlgmr.msra.gmra.mxu1 %v3180_v5  ;;  %v842_v50 = vsub.f32 %v3183_v6, %v841_v22 }
 0x10e   :  { %1172 = vmatpush1.msra.mxu1 %v2766_v26  ;;  %v835_v12 = vand.u32 4294901760, %v834_v15 }
 0x10f   :  { %1173 = vmatprep.subr.mxu1 %v3839_v52  ;;  %v843_v24 = vand.u32 4294901760, %v842_v50 }
 0x110   :  { %1175 = vmatpush1.msra.mxu1 %v2775_v30  ;;  %1262 = vmatprep.mubr.f32.mxu1 %v835_v12  ;;  %v836_v14 = vsub.f32 %v834_v15, %v835_v12 }
 0x111   :  { %1176 = vmatprep.subr.mxu1 %v3839_v52 }
 0x112   :  { %1178 = vmatpush1.msra.mxu1 %v2835_v18  ;;  %v837_v27 = vand.u32 4294901760, %v836_v14 }
 0x113   :  { %1179 = vmatprep.subr.mxu1 %v3839_v52 }
 0x114   :  { %1181 = vmatpush1.msra.mxu1 %v2843_v31  ;;  %838 = vmatprep.mubr.f32.mxu0 %v837_v27 }
 0x115   :  { %1182 = vmatprep.subr.mxu1 %v3839_v52  ;;  %844 = vmatmul.mubr.f32.vlgmr.msra.gmra.mxu0 %v843_v24  ;;  %v1524_v24 = vld [vmem:[%s3772_s5 + $0x40] sm:$0xff] }
 0x116   :  { %1049 = vmatpush1.msra.mxu0 %v2784_v32  ;;  %1184 = vmatpush1.msra.mxu1 %v2854_v36 }
 0x117   :  { %1050 = vmatprep.subr.mxu0 %v3839_v52  ;;  %1162 = vmatprep.mubr.f32.mxu0 %v834_v15 }
 0x118   :  { %1185 = vmatprep.subr.mxu1 %v3839_v52  ;;  %1053 = vmatpush1.msra.mxu0 %v2793_v4 }
 0x119   :  { %1187 = vmatpush1.msra.mxu1 %v2869_v45  ;;  %1054 = vmatprep.subr.mxu0 %v3839_v52 }
 0x11a   :  { %1188 = vmatprep.subr.mxu1 %v3839_v52  ;;  %1057 = vmatpush1.msra.mxu0 %v2841_v25 }
 0x11b   :  { %1190 = vmatpush1.msra.mxu1 %v2879_v58  ;;  %1058 = vmatprep.subr.mxu0 %v3839_v52 }
 0x11c   :  { %1191 = vmatprep.subr.mxu1 %v3839_v52  ;;  %1061 = vmatpush1.msra.mxu0 %v2852_v35 }
 0x11d   :  { %1193 = vmatpush1.msra.mxu1 %v2894_v9  ;;  %1062 = vmatprep.subr.mxu0 %v3839_v52 }
 0x11e   :  { %1194 = vmatprep.subr.mxu1 %v3839_v52  ;;  %1065 = vmatpush1.msra.mxu0 %v2866_v42 }
 0x11f   :  { %1196 = vmatpush1.msra.mxu1 %v2907_v44  ;;  %1066 = vmatprep.subr.mxu0 %v3839_v52 }
 0x120   :  { %1197 = vmatprep.subr.mxu1 %v3839_v52  ;;  %1069 = vmatpush1.msra.mxu0 %v2882_v59 }
 0x121   :  { %1199 = vmatpush1.msra.mxu1 %v2925_v60  ;;  %1070 = vmatprep.subr.mxu0 %v3839_v52 }
 0x122   :  { %1200 = vmatprep.subr.mxu1 %v3839_v52  ;;  %1073 = vmatpush1.msra.mxu0 %v2892_v7 }
 0x123   :  { %1202 = vmatpush1.msra.mxu1 %v2941_v29  ;;  %1074 = vmatprep.subr.mxu0 %v3839_v52 }
 0x124   :  { %1203 = vmatprep.subr.mxu1 %v3839_v52  ;;  %1077 = vmatpush1.msra.mxu0 %v2905_v43 }
 0x125   :  { %1205 = vmatpush1.msra.mxu1 %v2952_v53  ;;  %1078 = vmatprep.subr.mxu0 %v3839_v52 }
 0x126   :  { %1206 = vmatprep.subr.mxu1 %v3839_v52  ;;  %1081 = vmatpush1.msra.mxu0 %v2923_v57 }
 0x127   :  { %1208 = vmatpush1.msra.mxu1 %v2969_v11  ;;  %1082 = vmatprep.subr.mxu0 %v3839_v52 }
 0x128   :  { %1209 = vmatprep.subr.mxu1 %v3839_v52  ;;  %1085 = vmatpush1.msra.mxu0 %v2938_v20 }
 0x129   :  { %1211 = vmatpush1.msra.mxu1 %v2982_v37  ;;  %1086 = vmatprep.subr.mxu0 %v3839_v52 }
 0x12a   :  { %1212 = vmatprep.subr.mxu1 %v3839_v52  ;;  %1089 = vmatpush1.msra.mxu0 %v2956_v54 }
 0x12b   :  { %1214 = vmatpush1.msra.mxu1 %v3000_v1  ;;  %1090 = vmatprep.subr.mxu0 %v3839_v52 }
 0x12c   :  { %1215 = vmatprep.subr.mxu1 %v3839_v52  ;;  %1093 = vmatpush1.msra.mxu0 %v2967_v10 }
 0x12d   :  { %1217 = vmatpush1.msra.mxu1 %v3016_v61  ;;  %1094 = vmatprep.subr.mxu0 %v3839_v52 }
 0x12e   :  { %1232 = vmatprep.subr.mxu1 %v3839_v52  ;;  %1097 = vmatpush1.msra.mxu0 %v2980_v33 }
 0x12f   :  { %1234 = vmatpush2.msra.mxu1 %v3027_v38  ;;  %1098 = vmatprep.subr.mxu0 %v3839_v52 }
 0x130   :  { %1235 = vmatprep.subr.mxu1 %v3839_v52  ;;  %1101 = vmatpush1.msra.mxu0 %v2998_v63 }
 0x131   :  { %1237 = vmatpush2.msra.mxu1 %v3044_v17  ;;  %1102 = vmatprep.subr.mxu0 %v3839_v52 }
 0x132   :  { %1238 = vmatprep.subr.mxu1 %v3839_v52  ;;  %1105 = vmatpush1.msra.mxu0 %v3013_v56 }
 0x133   :  { %1240 = vmatpush2.msra.mxu1 %v3057_v39  ;;  %1106 = vmatprep.subr.mxu0 %v3839_v52 }
 0x134   :  { %1241 = vmatprep.subr.mxu1 %v3839_v52  ;;  %1109 = vmatpush1.msra.mxu0 %v3031_v47 }
 0x135   :  { %1243 = vmatpush2.msra.mxu1 %v3075_v19  ;;  %1124 = vmatprep.subr.mxu0 %v3839_v52 }
 0x136   :  { %1244 = vmatprep.subr.mxu1 %v3839_v52  ;;  %1127 = vmatpush2.msra.mxu0 %v3042_v16 }
 0x137   :  { %1246 = vmatpush2.msra.mxu1 %v3091_v49  ;;  %1128 = vmatprep.subr.mxu0 %v3839_v52 }
 0x138   :  { %1247 = vmatprep.subr.mxu1 %v3839_v52  ;;  %1131 = vmatpush2.msra.mxu0 %v3840_v2 }
 0x139   :  { %1249 = vmatpush2.msra.mxu1 %v3841_v51  ;;  %1132 = vmatprep.subr.mxu0 %v3839_v52 }
 0x13a   :  { %1250 = vmatprep.subr.mxu1 %v3839_v52  ;;  %1135 = vmatpush2.msra.mxu0 %v3842_v48 }
 0x13b   :  { %1252 = vmatpush2.msra.mxu1 %v3843_v8  ;;  %1136 = vmatprep.subr.mxu0 %v3839_v52 }
 0x13c   :  { %1253 = vmatprep.subr.mxu1 %v3839_v52  ;;  %1139 = vmatpush2.msra.mxu0 %v3844_v40 }
 0x13d   :  { %1255 = vmatpush2.msra.mxu1 %v3845_v28  ;;  %1140 = vmatprep.subr.mxu0 %v3839_v52 }
 0x13e   :  { %1256 = vmatprep.subr.mxu1 %v3839_v52  ;;  %1143 = vmatpush2.msra.mxu0 %v3846_v62 }
 0x13f   :  { %1258 = vmatpush2.msra.mxu1 %v3847_v55  ;;  %1144 = vmatprep.subr.mxu0 %v3839_v52 }
 0x140   :  { %1266 = vmatmul.mubr.f32.vlgmr.msra.gmra.mxu1 %v841_v22  ;;  %1418 = vmatprep.subr.mxu1 %v3839_v52 }
 0x141   :  { %1147 = vmatpush2.msra.mxu0 %v3848_v21  ;;  %1420 = vmatpush1.msra.mxu1 %v2766_v26  ;;  %v3851_v26 = vld [vmem:[#allocation13_spill] sm:$0xff] }
 0x142   :  { %1508 = vmatprep.mubr.f32.mxu1 %v3185_v46  ;;  %1148 = vmatprep.subr.mxu0 %v3839_v52 }
 0x143   :  { %1421 = vmatprep.subr.mxu1 %v3839_v52  ;;  %1151 = vmatpush2.msra.mxu0 %v3849_v13 }
 0x144   :  { %1423 = vmatpush1.msra.mxu1 %v2775_v30  ;;  %1152 = vmatprep.subr.mxu0 %v3839_v52  ;;  %v3852_v30 = vand.u32 4294901760, %v2784_v32  ;;  %v3854_v32 = vand.u32 4294901760, %v2841_v25  ;;  %v3857_v25 = vand.u32 4294901760, %v2882_v59  ;;  %v3863_v59 = vand.u32 4294901760, %v2967_v10 }
 0x145   :  { %1424 = vmatprep.subr.mxu1 %v3839_v52  ;;  %1155 = vmatpush2.msra.mxu0 %v3850_v34  ;;  %v3874_v10 = vand.u32 4294901760, %v3849_v13 }
 0x146   :  { %1426 = vmatpush1.msra.mxu1 %v2835_v18  ;;  %1156 = vmatprep.subr.mxu0 %v3839_v52  ;;  %v3853_v18 = vand.u32 4294901760, %v2793_v4  ;;  %v3856_v4 = vand.u32 4294901760, %v2866_v42  ;;  %v3860_v42 = vand.u32 4294901760, %v2923_v57  ;;  %v3868_v57 = vand.u32 4294901760, %v3042_v16 }
 0x147   :  { %1427 = vmatprep.subr.mxu1 %v3839_v52  ;;  %1159 = vmatpush2.msra.mxu0 %v3851_v26 }
 0x148   :  { %1429 = vmatpush1.msra.mxu1 %v2843_v31  ;;  %1165 = vmatmul.mubr.f32.vlgmr.msra.gmra.mxu0 %v3183_v6  ;;  %v3855_v31 = vand.u32 4294901760, %v2852_v35  ;;  %v3858_v35 = vand.u32 4294901760, %v2892_v7  ;;  %v3864_v7 = vand.u32 4294901760, %v2980_v33  ;;  %v3876_v33 = vand.u32 4294901760, %v3851_v26 }
 0x149   :  { %1271 = vmatprep.subr.mxu0 %v3839_v52  ;;  %1430 = vmatprep.subr.mxu1 %v3839_v52 }
 0x14a   :  { %1275 = vmatpush1.msra.mxu0 %v3852_v30  ;;  %1411 = vmatprep.mubr.f32.mxu0 %v3185_v46 }
 0x14b   :  { %1432 = vmatpush1.msra.mxu1 %v2854_v36  ;;  %1276 = vmatprep.subr.mxu0 %v3839_v52  ;;  %v3859_v36 = vand.u32 4294901760, %v2905_v43  ;;  %v3866_v43 = vand.u32 4294901760, %v3013_v56 }
 0x14c   :  { %1433 = vmatprep.subr.mxu1 %v3839_v52  ;;  %1280 = vmatpush1.msra.mxu0 %v3853_v18  ;;  %v1520_v18 = vld [vmem:[%s3772_s5 + $0x20] sm:$0xff] }
 0x14d   :  { %1435 = vmatpush1.msra.mxu1 %v2869_v45  ;;  %1281 = vmatprep.subr.mxu0 %v3839_v52  ;;  %v3861_v45 = vand.u32 4294901760, %v2938_v20  ;;  %v3870_v20 = vand.u32 4294901760, %v3842_v48 }
 0x14e   :  { %1436 = vmatprep.subr.mxu1 %v3839_v52  ;;  %1285 = vmatpush1.msra.mxu0 %v3854_v32 }
 0x14f   :  { %1438 = vmatpush1.msra.mxu1 %v2879_v58  ;;  %1286 = vmatprep.subr.mxu0 %v3839_v52  ;;  %v3862_v58 = vand.u32 4294901760, %v2956_v54  ;;  %v3873_v54 = vand.u32 4294901760, %v3848_v21  ;;  %v1521_v21 = vld [vmem:[%s3772_s5 + $0x28] sm:$0xff] }
 0x150   :  { %1439 = vmatprep.subr.mxu1 %v3839_v52  ;;  %1290 = vmatpush1.msra.mxu0 %v3855_v31  ;;  %v3522_v30 = vand.u32 4294901760, %v1521_v21 }
 0x151   :  { %1441 = vmatpush1.msra.mxu1 %v2894_v9  ;;  %1291 = vmatprep.subr.mxu0 %v3839_v52  ;;  %v3865_v9 = vand.u32 4294901760, %v2998_v63  ;;  %v1527_v63 = vld [vmem:[%s3772_s5 + $0x58] sm:$0xff] }
 0x152   :  { %1442 = vmatprep.subr.mxu1 %v3839_v52  ;;  %1295 = vmatpush1.msra.mxu0 %v3856_v4 }
 0x153   :  { %1444 = vmatpush1.msra.mxu1 %v2907_v44  ;;  %1296 = vmatprep.subr.mxu0 %v3839_v52  ;;  %v3867_v44 = vand.u32 4294901760, %v3031_v47  ;;  %v1525_v47 = vld [vmem:[%s3772_s5 + $0x48] sm:$0xff] }
 0x154   :  { %1445 = vmatprep.subr.mxu1 %v3839_v52  ;;  %1300 = vmatpush1.msra.mxu0 %v3857_v25  ;;  %v3534_v25 = vsub.f32 %v1521_v21, %v3522_v30 }
 0x155   :  { %1447 = vmatpush1.msra.mxu1 %v2925_v60  ;;  %1301 = vmatprep.subr.mxu0 %v3839_v52  ;;  %v3869_v60 = vand.u32 4294901760, %v3840_v2  ;;  %v3489_v2 = vand.u32 4294901760, %v1524_v24 }
 0x156   :  { %1448 = vmatprep.subr.mxu1 %v3839_v52  ;;  %1305 = vmatpush1.msra.mxu0 %v3858_v35  ;;  %v3537_v35 = vand.u32 4294901760, %v1520_v18 }
 0x157   :  { %1450 = vmatpush1.msra.mxu1 %v2941_v29  ;;  %1306 = vmatprep.subr.mxu0 %v3839_v52  ;;  %v3871_v29 = vand.u32 4294901760, %v3844_v40  ;;  %v3495_v48 = vsub.f32 %v1524_v24, %v3489_v2  ;;  %v1522_v40 = vld [vmem:[%s3772_s5 + $0x30] sm:$0xff] }
 0x158   :  { %1451 = vmatprep.subr.mxu1 %v3839_v52  ;;  %1310 = vmatpush1.msra.mxu0 %v3859_v36  ;;  %v1519_v36 = vld [vmem:[%s3772_s5 + $0x18] sm:$0xff] }
 0x159   :  { %1453 = vmatpush1.msra.mxu1 %v2952_v53  ;;  %1311 = vmatprep.subr.mxu0 %v3839_v52  ;;  %v3872_v53 = vand.u32 4294901760, %v3846_v62 }
 0x15a   :  { %1454 = vmatprep.subr.mxu1 %v3839_v52  ;;  %1315 = vmatpush1.msra.mxu0 %v3860_v42 }
 0x15b   :  { %1456 = vmatpush1.msra.mxu1 %v2969_v11  ;;  %1316 = vmatprep.subr.mxu0 %v3839_v52  ;;  %v3875_v11 = vand.u32 4294901760, %v3850_v34 }
 0x15c   :  { %1457 = vmatprep.subr.mxu1 %v3839_v52  ;;  %1320 = vmatpush1.msra.mxu0 %v3861_v45 }
 0x15d   :  { %1459 = vmatpush1.msra.mxu1 %v2982_v37  ;;  %1321 = vmatprep.subr.mxu0 %v3839_v52  ;;  %v1528_v37 = vld [vmem:[%s3772_s5 + $0x60] sm:$0xf] }
 0x15e   :  { %1460 = vmatprep.subr.mxu1 %v3839_v52  ;;  %1325 = vmatpush1.msra.mxu0 %v3862_v58  ;;  %v1542_v56 = vsel %vm1540_vm2, %v1528_v37, 0  ;;  %v1690_v58 = vand.u32 4294901760, %v3534_v25  ;;  %v1516_v37 = vld [vmem:[%s3772_s5] sm:$0xff] }
 0x15f   :  { %1462 = vmatpush1.msra.mxu1 %v3000_v1  ;;  %1326 = vmatprep.subr.mxu0 %v3839_v52  ;;  %v1526_v1 = vld [vmem:[%s3772_s5 + $0x50] sm:$0xff]  ;;  %v3442_v16 = vand.u32 4294901760, %v1542_v56 }
 0x160   :  { %1463 = vmatprep.subr.mxu1 %v3839_v52  ;;  %1330 = vmatpush1.msra.mxu0 %v3863_v59  ;;  %v3547_v59 = vand.u32 4294901760, %v1519_v36 }
 0x161   :  { %1465 = vmatpush1.msra.mxu1 %v3016_v61  ;;  %1331 = vmatprep.subr.mxu0 %v3839_v52  ;;  %v3435_v61 = vand.u32 4294901760, %v1527_v63 }
 0x162   :  { %1480 = vmatprep.subr.mxu1 %v3839_v52  ;;  %1335 = vmatpush1.msra.mxu0 %v3864_v7  ;;  %v3551_v7 = vsub.f32 %v1520_v18, %v3537_v35  ;;  %v2157_v18 = vld [vmem:[%s3773_s4] ss:$0 sm:$0xff] }
 0x163   :  { %1482 = vmatpush2.msra.mxu1 %v3027_v38  ;;  %1336 = vmatprep.subr.mxu0 %v3839_v52  ;;  %v3437_v38 = vand.u32 4294901760, %v1526_v1 }
 0x164   :  { %1483 = vmatprep.subr.mxu1 %v3839_v52  ;;  %1340 = vmatpush1.msra.mxu0 %v3865_v9  ;;  %v1518_v9 = vld [vmem:[%s3772_s5 + $0x10] sm:$0xff] }
 0x165   :  { %1485 = vmatpush2.msra.mxu1 %v3044_v17  ;;  %1341 = vmatprep.subr.mxu0 %v3839_v52  ;;  %v3444_v17 = vand.u32 4294901760, %v1525_v47 }
 0x166   :  { %1486 = vmatprep.subr.mxu1 %v3839_v52  ;;  %1345 = vmatpush1.msra.mxu0 %v3866_v43 }
 0x167   :  { %1488 = vmatpush2.msra.mxu1 %v3057_v39  ;;  %1346 = vmatprep.subr.mxu0 %v3839_v52  ;;  %v3447_v39 = vsub.f32 %v1527_v63, %v3435_v61  ;;  %v3456_v0 = vsub.f32 %v1525_v47, %v3444_v17  ;;  %v3594_v47 = vand.u32 4294901760, %v1516_v37 }
 0x168   :  { %1489 = vmatprep.subr.mxu1 %v3839_v52  ;;  %1350 = vmatpush1.msra.mxu0 %v3867_v44  ;;  %v1691_v44 = vsub.f32 %v3534_v25, %v1690_v58 }
 0x169   :  { %1491 = vmatpush2.msra.mxu1 %v3075_v19  ;;  %1365 = vmatprep.subr.mxu0 %v3839_v52  ;;  %v3450_v19 = vsub.f32 %v1526_v1, %v3437_v38  ;;  %v1648_v41 = vand.u32 4294901760, %v3447_v39  ;;  %v1662_v6 = vand.u32 4294901760, %v3456_v0 }
 0x16a   :  { %1492 = vmatprep.subr.mxu1 %v3839_v52  ;;  %1369 = vmatpush2.msra.mxu0 %v3868_v57  ;;  %v3561_v57 = vsub.f32 %v1519_v36, %v3547_v59 }
 0x16b   :  { %1494 = vmatpush2.msra.mxu1 %v3091_v49  ;;  %1370 = vmatprep.subr.mxu0 %v3839_v52  ;;  %v3453_v49 = vsub.f32 %v1542_v56, %v3442_v16  ;;  %v1649_v3 = vsub.f32 %v3447_v39, %v1648_v41  ;;  %v1663_v50 = vsub.f32 %v3456_v0, %v1662_v6 }
 0x16c   :  { %1495 = vmatprep.subr.mxu1 %v3839_v52  ;;  %1374 = vmatpush2.msra.mxu0 %v3869_v60  ;;  %v3563_v60 = vand.u32 4294901760, %v1518_v9 }
 0x16d   :  { %1497 = vmatpush2.msra.mxu1 %v3841_v51  ;;  %1375 = vmatprep.subr.mxu0 %v3839_v52  ;;  %v1641_v23 = vand.u32 4294901760, %v3453_v49  ;;  %v1650_v12 = vand.u32 4294901760, %v1649_v3  ;;  %v1664_v27 = vand.u32 4294901760, %v1663_v50  ;;  %v1523_v51 = vld [vmem:[%s3772_s5 + $0x38] sm:$0xff] }
 0x16e   :  { %1498 = vmatprep.subr.mxu1 %v3839_v52  ;;  %1379 = vmatpush2.msra.mxu0 %v3870_v20  ;;  %v1697_v20 = vand.u32 4294901760, %v3551_v7 }
 0x16f   :  { %1500 = vmatpush2.msra.mxu1 %v3843_v8  ;;  %1380 = vmatprep.subr.mxu0 %v3839_v52  ;;  %v1642_v46 = vsub.f32 %v3453_v49, %v1641_v23  ;;  %v3497_v8 = vand.u32 4294901760, %v1523_v51 }
 0x170   :  { %1501 = vmatprep.subr.mxu1 %v3839_v52  ;;  %1384 = vmatpush2.msra.mxu0 %v3871_v29  ;;  %v1517_v29 = vld [vmem:[%s3772_s5 + $0x8] sm:$0xff] }
 0x171   :  { %1503 = vmatpush2.msra.mxu1 %v3845_v28  ;;  %1385 = vmatprep.subr.mxu0 %v3839_v52  ;;  %v1643_v15 = vand.u32 4294901760, %v1642_v46  ;;  %v1669_v28 = vand.u32 4294901760, %v3495_v48  ;;  %v3506_v62 = vsub.f32 %v1523_v51, %v3497_v8 }
 0x172   :  { %1504 = vmatprep.subr.mxu1 %v3839_v52  ;;  %1389 = vmatpush2.msra.mxu0 %v3872_v53  ;;  %v1692_v53 = vand.u32 4294901760, %v1691_v44 }
 0x173   :  { %1506 = vmatpush2.msra.mxu1 %v3847_v55  ;;  %1390 = vmatprep.subr.mxu0 %v3839_v52  ;;  %v3508_v55 = vand.u32 4294901760, %v1522_v40  ;;  %v1670_v13 = vsub.f32 %v3495_v48, %v1669_v28  ;;  %v1676_v34 = vand.u32 4294901760, %v3506_v62 }
 0x174   :  { %1510 = vmatmul.mubr.f32.vlgmr.msra.gmra.mxu1 %v3180_v5  ;;  %1394 = vmatpush2.msra.mxu0 %v3873_v54  ;;  %v1704_v54 = vand.u32 4294901760, %v3561_v57 }
 0x175   :  { %1395 = vmatprep.subr.mxu0 %v3839_v52  ;;  %2272 = vmatprep.subr.mxu1 %v3839_v52  ;;  %v3520_v26 = vsub.f32 %v1522_v40, %v3508_v55  ;;  %v1671_v32 = vand.u32 4294901760, %v1670_v13  ;;  %v1677_v31 = vsub.f32 %v3506_v62, %v1676_v34 }
 0x176   :  { %1399 = vmatpush2.msra.mxu0 %v3874_v10  ;;  %2273 = vmatpush3.msra.mxu1 %v1643_v15  ;;  %v3574_v10 = vsub.f32 %v1518_v9, %v3563_v60  ;;  %v1705_v63 = vsub.f32 %v3561_v57, %v1704_v54 }
 0x177   :  { %1400 = vmatprep.subr.mxu0 %v3839_v52  ;;  %2274 = vmatprep.subr.mxu1 %v3839_v52  ;;  %v1683_v4 = vand.u32 4294901760, %v3520_v26  ;;  %v1678_v42 = vand.u32 4294901760, %v1677_v31 }
 0x178   :  { %1404 = vmatpush2.msra.mxu0 %v3875_v11  ;;  %2275 = vmatpush3.msra.mxu1 %v1650_v12  ;;  %v3576_v11 = vand.u32 4294901760, %v1517_v29  ;;  %v1711_v1 = vand.u32 4294901760, %v3574_v10  ;;  %v1706_v46 = vand.u32 4294901760, %v1705_v63  ;;  %v3604_v12 = vsub.f32 %v1516_v37, %v3594_v47 }
 0x179   :  { %1405 = vmatprep.subr.mxu0 %v3839_v52  ;;  %2276 = vmatprep.subr.mxu1 %v3839_v52  ;;  %v1684_v45 = vsub.f32 %v3520_v26, %v1683_v4 }
 0x17a   :  { %1409 = vmatpush2.msra.mxu0 %v3876_v33  ;;  %v1698_v33 = vsub.f32 %v3551_v7, %v1697_v20  ;;  %v3592_v56 = vsub.f32 %v1517_v29, %v3576_v11  ;;  %2298 = vmatprep.mubr.msk.f32.mxu1 %vm2421_vm3, %v3839_v52 }
 0x17b   :  { %1413 = vmatmul.mubr.f32.vlgmr.msra.gmra.mxu0 %v3180_v5  ;;  %2243 = vmatprep.subr.mxu0 %v3839_v52  ;;  %v1655_v5 = vand.u32 4294901760, %v3450_v19  ;;  %v1685_v43 = vand.u32 4294901760, %v1684_v45 }
 0x17c   :  { %2244 = vmatpush3.msra.mxu0 %v3442_v16  ;;  %v1699_v3 = vand.u32 4294901760, %v1698_v33  ;;  %v1718_v15 = vand.u32 4294901760, %v3592_v56  ;;  %2269 = vmatprep.mubr.msk.f32.mxu0 %vm2421_vm3, %v3839_v52 }
 0x17d   :  { %2245 = vmatprep.subr.mxu0 %v3839_v52  ;;  %v1656_v22 = vsub.f32 %v3450_v19, %v1655_v5 }
 0x17e   :  { %2246 = vmatpush3.msra.mxu0 %v3435_v61 }
 0x17f   :  { %2247 = vmatprep.subr.mxu0 %v3839_v52  ;;  %v1657_v14 = vand.u32 4294901760, %v1656_v22  ;;  %v1712_v22 = vsub.f32 %v3574_v10, %v1711_v1 }
 0x180   :  { %2248 = vmatpush3.msra.mxu0 %v3437_v38 }
 0x181   :  { %2249 = vmatprep.subr.mxu0 %v3839_v52  ;;  %2277 = vmatpush3.msra.mxu1 %v1657_v14  ;;  %v1713_v50 = vand.u32 4294901760, %v1712_v22  ;;  %v1719_v14 = vsub.f32 %v3592_v56, %v1718_v15 }
 0x182   :  { %2250 = vmatpush3.msra.mxu0 %v3444_v17  ;;  %2278 = vmatprep.subr.mxu1 %v3839_v52 }
 0x183   :  { %2251 = vmatprep.subr.mxu0 %v3839_v52  ;;  %2279 = vmatpush3.msra.mxu1 %v1664_v27  ;;  %v1725_v27 = vand.u32 4294901760, %v3604_v12  ;;  %v1720_v24 = vand.u32 4294901760, %v1719_v14 }
 0x184   :  { %2280 = vmatprep.subr.mxu1 %v3839_v52  ;;  %2252 = vmatpush3.msra.mxu0 %v3489_v2 }
 0x185   :  { %2253 = vmatprep.subr.mxu0 %v3839_v52  ;;  %2281 = vmatpush3.msra.mxu1 %v1671_v32  ;;  %v1726_v51 = vsub.f32 %v3604_v12, %v1725_v27 }
 0x186   :  { %2254 = vmatpush3.msra.mxu0 %v3497_v8  ;;  %2282 = vmatprep.subr.mxu1 %v3839_v52 }
 0x187   :  { %2255 = vmatprep.subr.mxu0 %v3839_v52  ;;  %2283 = vmatpush3.msra.mxu1 %v1678_v42  ;;  %v1727_v40 = vand.u32 4294901760, %v1726_v51 }
 0x188   :  { %2256 = vmatpush3.msra.mxu0 %v3508_v55  ;;  %2284 = vmatprep.subr.mxu1 %v3839_v52 }
 0x189   :  { %2257 = vmatprep.subr.mxu0 %v3839_v52  ;;  %2285 = vmatpush3.msra.mxu1 %v1685_v43 }
 0x18a   :  { %2258 = vmatpush3.msra.mxu0 %v3522_v30  ;;  %2286 = vmatprep.subr.mxu1 %v3839_v52 }
 0x18b   :  { %2259 = vmatprep.subr.mxu0 %v3839_v52  ;;  %2287 = vmatpush3.msra.mxu1 %v1692_v53 }
 0x18c   :  { %2260 = vmatpush3.msra.mxu0 %v3537_v35  ;;  %2288 = vmatprep.subr.mxu1 %v3839_v52 }
 0x18d   :  { %2261 = vmatprep.subr.mxu0 %v3839_v52  ;;  %2289 = vmatpush3.msra.mxu1 %v1699_v3 }
 0x18e   :  { %2262 = vmatpush3.msra.mxu0 %v3547_v59  ;;  %2290 = vmatprep.subr.mxu1 %v3839_v52 }
 0x18f   :  { %2263 = vmatprep.subr.mxu0 %v3839_v52  ;;  %2291 = vmatpush3.msra.mxu1 %v1706_v46 }
 0x190   :  { %2264 = vmatpush3.msra.mxu0 %v3563_v60  ;;  %2292 = vmatprep.subr.mxu1 %v3839_v52 }
 0x191   :  { %2265 = vmatprep.subr.mxu0 %v3839_v52  ;;  %2293 = vmatpush3.msra.mxu1 %v1713_v50 }
 0x192   :  { %2266 = vmatpush3.msra.mxu0 %v3576_v11  ;;  %2294 = vmatprep.subr.mxu1 %v3839_v52 }
 0x193   :  { %2267 = vmatprep.subr.mxu0 %v3839_v52  ;;  %2295 = vmatpush3.msra.mxu1 %v1720_v24 }
 0x194   :  { %2268 = vmatpush3.msra.mxu0 %v3594_v47  ;;  %2296 = vmatprep.subr.mxu1 %v3839_v52 }
 0x195   :  { %2301 = vmatprep.subr.mxu0 %v3839_v52  ;;  %2297 = vmatpush3.msra.mxu1 %v1727_v40 }
 0x196   :  { %2330 = vmatprep.subr.mxu1 %v3839_v52 }
 0x1cd   :  { %v1042_v21 = vpop.f32.mrf.mxu1 }
 0x1cf   :  { %v1044_v13 = vpop.f32.mrf.mxu1 }
 0x1d5   :  { %v845_v32 = vpop.f32.mrf.mxu0 }
 0x1d6   :  { %v846_v31 = vadd.f32 %v2157_v18, %v845_v32 }
 0x1d7   :  { %v847_v36 = vpop.f32.mrf.mxu0 }
 0x1d8   :  { %v1043_v42 = vadd.f32 %v1042_v21, %v846_v31 }
 0x200   :  { %v1267_v45 = vpop.f32.mrf.mxu1 }
 0x202   :  { %v1269_v9 = vpop.f32.mrf.mxu1 }
 0x208   :  { %v1166_v43 = vpop.f32.mrf.mxu0 }
 0x209   :  { %v1167_v53 = vadd.f32 %v1166_v43, %v1043_v42 }
 0x20a   :  { %v1168_v44 = vpop.f32.mrf.mxu0 }
 0x20b   :  { %v1268_v37 = vadd.f32 %v1267_v45, %v1167_v53 }
 0x234   :  { %v1511_v29 = vpop.f32.mrf.mxu1 }
 0x236   :  { %v1513_v33 = vpop.f32.mrf.mxu1 }
 0x23b   :  { %v1414_v63 = vpop.f32.mrf.mxu0 }
 0x23c   :  { %v1415_v3 = vadd.f32 %v1414_v63, %v1268_v37 }
 0x23d   :  { %v1416_v46 = vpop.f32.mrf.mxu0 }
 0x23e   :  { %v1512_v22 = vadd.f32 %v1511_v29, %v1415_v3 }
 0x240   :  { %v1515_v50 = vmax.f32 %v1512_v22, 0.0 }
 0x242   :  { %v1538_v14 = vsel %vm1536_vm4, %v1515_v50, 0 }
 0x243   :  { %v3628_v24 = vand.u32 4294901760, %v1538_v14 }
 0x245   :  { %v3631_v51 = vsub.f32 %v1538_v14, %v3628_v24  ;;  %2299 = vmatmul.mubr.f32.vlgmr.msra.gmra.mxu1 %v3628_v24 }
 0x246   :  { %2331 = vmatpush3.msra.mxu1 %v3442_v16  ;;  %2356 = vmatprep.mubr.msk.f32.mxu1 %vm2421_vm3, %v3839_v52 }
 0x247   :  { %2332 = vmatprep.subr.mxu1 %v3839_v52  ;;  %v1624_v40 = vand.u32 4294901760, %v3631_v51 }
 0x248   :  { %2333 = vmatpush3.msra.mxu1 %v3435_v61 }
 0x249   :  { %2334 = vmatprep.subr.mxu1 %v3839_v52  ;;  %v1625_v21 = vsub.f32 %v3631_v51, %v1624_v40 }
 0x24a   :  { %2335 = vmatpush3.msra.mxu1 %v3437_v38 }
 0x24b   :  { %2336 = vmatprep.subr.mxu1 %v3839_v52  ;;  %v1626_v13 = vand.u32 4294901760, %v1625_v21 }
 0x24c   :  { %2337 = vmatpush3.msra.mxu1 %v3444_v17 }
 0x24d   :  { %2338 = vmatprep.subr.mxu1 %v3839_v52  ;;  %2270 = vmatmul.mubr.f32.vlgmr.msra.gmra.mxu0 %v1626_v13 }
 0x24e   :  { %2302 = vmatpush3.msra.mxu0 %v3453_v49  ;;  %2339 = vmatpush3.msra.mxu1 %v3489_v2 }
 0x24f   :  { %2303 = vmatprep.subr.mxu0 %v3839_v52  ;;  %2340 = vmatprep.subr.mxu1 %v3839_v52 }
 0x250   :  { %2304 = vmatpush3.msra.mxu0 %v3447_v39  ;;  %2341 = vmatpush3.msra.mxu1 %v3497_v8 }
 0x251   :  { %2305 = vmatprep.subr.mxu0 %v3839_v52  ;;  %2342 = vmatprep.subr.mxu1 %v3839_v52 }
 0x252   :  { %2306 = vmatpush3.msra.mxu0 %v3450_v19  ;;  %2343 = vmatpush3.msra.mxu1 %v3508_v55 }
 0x253   :  { %2307 = vmatprep.subr.mxu0 %v3839_v52  ;;  %2344 = vmatprep.subr.mxu1 %v3839_v52 }
 0x254   :  { %2308 = vmatpush3.msra.mxu0 %v3456_v0  ;;  %2345 = vmatpush3.msra.mxu1 %v3522_v30 }
 0x255   :  { %2309 = vmatprep.subr.mxu0 %v3839_v52  ;;  %2346 = vmatprep.subr.mxu1 %v3839_v52 }
 0x256   :  { %2310 = vmatpush3.msra.mxu0 %v3495_v48  ;;  %2347 = vmatpush3.msra.mxu1 %v3537_v35 }
 0x257   :  { %2311 = vmatprep.subr.mxu0 %v3839_v52  ;;  %2348 = vmatprep.subr.mxu1 %v3839_v52 }
 0x258   :  { %2312 = vmatpush3.msra.mxu0 %v3506_v62  ;;  %2349 = vmatpush3.msra.mxu1 %v3547_v59 }
 0x259   :  { %2313 = vmatprep.subr.mxu0 %v3839_v52  ;;  %2350 = vmatprep.subr.mxu1 %v3839_v52 }
 0x25a   :  { %2314 = vmatpush3.msra.mxu0 %v3520_v26  ;;  %2351 = vmatpush3.msra.mxu1 %v3563_v60 }
 0x25b   :  { %2315 = vmatprep.subr.mxu0 %v3839_v52  ;;  %2352 = vmatprep.subr.mxu1 %v3839_v52 }
 0x25c   :  { %2316 = vmatpush3.msra.mxu0 %v3534_v25  ;;  %2353 = vmatpush3.msra.mxu1 %v3576_v11 }
 0x25d   :  { %2317 = vmatprep.subr.mxu0 %v3839_v52  ;;  %2354 = vmatprep.subr.mxu1 %v3839_v52 }
 0x25e   :  { %2318 = vmatpush3.msra.mxu0 %v3551_v7  ;;  %2355 = vmatpush3.msra.mxu1 %v3594_v47 }
 0x25f   :  { %2319 = vmatprep.subr.mxu0 %v3839_v52  ;;  %2357 = vmatmul.mubr.f32.vlgmr.msra.gmra.mxu1 %v1624_v40 }
 0x260   :  { %2388 = vmatprep.subr.mxu1 %v3839_v52  ;;  %2320 = vmatpush3.msra.mxu0 %v3561_v57 }
 0x261   :  { %2389 = vmatpush3.msra.mxu1 %v3442_v16  ;;  %2321 = vmatprep.subr.mxu0 %v3839_v52 }
 0x262   :  { %2390 = vmatprep.subr.mxu1 %v3839_v52  ;;  %2322 = vmatpush3.msra.mxu0 %v3574_v10 }
 0x263   :  { %2391 = vmatpush3.msra.mxu1 %v3435_v61  ;;  %2323 = vmatprep.subr.mxu0 %v3839_v52 }
 0x264   :  { %2392 = vmatprep.subr.mxu1 %v3839_v52  ;;  %2324 = vmatpush3.msra.mxu0 %v3592_v56 }
 0x265   :  { %2393 = vmatpush3.msra.mxu1 %v3437_v38  ;;  %2325 = vmatprep.subr.mxu0 %v3839_v52 }
 0x266   :  { %2394 = vmatprep.subr.mxu1 %v3839_v52  ;;  %2326 = vmatpush3.msra.mxu0 %v3604_v12 }
 0x267   :  { %2327 = vmatprep.mubr.msk.f32.mxu0 %vm2421_vm3, %v3839_v52  ;;  %2395 = vmatpush3.msra.mxu1 %v3444_v17 }
 0x268   :  { %2328 = vmatmul.mubr.f32.vlgmr.msra.gmra.mxu0 %v3631_v51  ;;  %2359 = vmatprep.subr.mxu0 %v3839_v52 }
 0x269   :  { %2396 = vmatprep.subr.mxu1 %v3839_v52  ;;  %2360 = vmatpush3.msra.mxu0 %v1641_v23 }
 0x26a   :  { %2397 = vmatpush3.msra.mxu1 %v3489_v2  ;;  %2361 = vmatprep.subr.mxu0 %v3839_v52 }
 0x26b   :  { %2398 = vmatprep.subr.mxu1 %v3839_v52  ;;  %2362 = vmatpush3.msra.mxu0 %v1648_v41  ;;  %v2158_v41 = vld [vmem:[%s3774_s6] ss:$0 sm:$0xff] }
 0x26c   :  { %2399 = vmatpush3.msra.mxu1 %v3497_v8  ;;  %2363 = vmatprep.subr.mxu0 %v3839_v52 }
 0x26d   :  { %2400 = vmatprep.subr.mxu1 %v3839_v52  ;;  %2364 = vmatpush3.msra.mxu0 %v1655_v5 }
 0x26e   :  { %2401 = vmatpush3.msra.mxu1 %v3508_v55  ;;  %2365 = vmatprep.subr.mxu0 %v3839_v52 }
 0x26f   :  { %2402 = vmatprep.subr.mxu1 %v3839_v52  ;;  %2366 = vmatpush3.msra.mxu0 %v1662_v6 }
 0x270   :  { %2403 = vmatpush3.msra.mxu1 %v3522_v30  ;;  %2367 = vmatprep.subr.mxu0 %v3839_v52 }
 0x271   :  { %2404 = vmatprep.subr.mxu1 %v3839_v52  ;;  %2368 = vmatpush3.msra.mxu0 %v1669_v28 }
 0x272   :  { %2405 = vmatpush3.msra.mxu1 %v3537_v35  ;;  %2369 = vmatprep.subr.mxu0 %v3839_v52 }
 0x273   :  { %2406 = vmatprep.subr.mxu1 %v3839_v52  ;;  %2370 = vmatpush3.msra.mxu0 %v1676_v34 }
 0x274   :  { %2407 = vmatpush3.msra.mxu1 %v3547_v59  ;;  %2371 = vmatprep.subr.mxu0 %v3839_v52 }
 0x275   :  { %2408 = vmatprep.subr.mxu1 %v3839_v52  ;;  %2372 = vmatpush3.msra.mxu0 %v1683_v4 }
 0x276   :  { %2409 = vmatpush3.msra.mxu1 %v3563_v60  ;;  %2373 = vmatprep.subr.mxu0 %v3839_v52 }
 0x277   :  { %2410 = vmatprep.subr.mxu1 %v3839_v52  ;;  %2374 = vmatpush3.msra.mxu0 %v1690_v58 }
 0x278   :  { %2411 = vmatpush3.msra.mxu1 %v3576_v11  ;;  %2375 = vmatprep.subr.mxu0 %v3839_v52 }
 0x279   :  { %2412 = vmatprep.subr.mxu1 %v3839_v52  ;;  %2376 = vmatpush3.msra.mxu0 %v1697_v20 }
 0x27a   :  { %2413 = vmatpush3.msra.mxu1 %v3594_v47  ;;  %2414 = vmatprep.mubr.msk.f32.mxu1 %vm2421_vm3, %v3839_v52 }
 0x27b   :  { %2377 = vmatprep.subr.mxu0 %v3839_v52  ;;  %2415 = vmatmul.mubr.f32.vlgmr.msra.gmra.mxu1 %v3628_v24 }
 0x27c   :  { %2378 = vmatpush3.msra.mxu0 %v1704_v54  ;;  %2385 = vmatprep.mubr.msk.f32.mxu0 %vm2421_vm3, %v3839_v52 }
 0x27d   :  { %2379 = vmatprep.subr.mxu0 %v3839_v52 }
 0x27e   :  { %2380 = vmatpush3.msra.mxu0 %v1711_v1 }
 0x27f   :  { %2381 = vmatprep.subr.mxu0 %v3839_v52 }
 0x280   :  { %2382 = vmatpush3.msra.mxu0 %v1718_v15 }
 0x281   :  { %2383 = vmatprep.subr.mxu0 %v3839_v52 }
 0x282   :  { %2384 = vmatpush3.msra.mxu0 %v1725_v27 }
 0x283   :  { %2386 = vmatmul.mubr.f32.vlgmr.msra.gmra.mxu0 %v3628_v24 }
 0x305   :  { %v1764_v61 = vpop.f32.mrf.mxu1 }
 0x307   :  { %v2300_v38 = vpop.f32.mrf.mxu1 }
 0x30d   :  { %v1628_v16 = vpop.f32.mrf.mxu0 }
 0x30e   :  { %v1629_v5 = vadd.f32 %v2158_v41, %v1628_v16 }
 0x30f   :  { %v2271_v17 = vpop.f32.mrf.mxu0 }
 0x310   :  { %v1765_v52 = vadd.f32 %v1764_v61, %v1629_v5 }
 0x31f   :  { %v1948_v39 = vpop.f32.mrf.mxu1 }
 0x321   :  { %v2358_v19 = vpop.f32.mrf.mxu1 }
 0x328   :  { %v1862_v49 = vpop.f32.mrf.mxu0 }
 0x329   :  { %v1863_v2 = vadd.f32 %v1862_v49, %v1765_v52 }
 0x32a   :  { %v2329_v0 = vpop.f32.mrf.mxu0 }
 0x32b   :  { %v1949_v48 = vadd.f32 %v1948_v39, %v1863_v2 }
 0x33b   :  { %v2142_v23 = vpop.f32.mrf.mxu1 }
 0x33d   :  { %v2416_v6 = vpop.f32.mrf.mxu1 }
 0x343   :  { %v2058_v8 = vpop.f32.mrf.mxu0 }
 0x344   :  { %v2059_v28 = vadd.f32 %v2058_v8, %v1949_v48 }
 0x345   :  { %v2387_v62 = vpop.f32.mrf.mxu0 }
 0x346   :  { %v2143_v55 = vadd.f32 %v2142_v23, %v2059_v28 }
 0x348   :  { %2147 = vrot.lane.b32.xlu0 %v2143_v55, %s2422_s11 }
 0x3ba   :  { %v2148_v34 = vpop.permute.xlu0 %2147 }
 0x3bb   :  { %v2150_v26 = vmul.f32 %v2148_v34, %v2143_v55 }
 0x3bd   :  { %2152 = vst.msk [vmem:[%s3775_s7] sm:$0x3] %vm2151_vm5, %v2150_v26 }

</bundles_post_ra>
